<compile_context>
chip_gen: v5e
topology: v5e:2x2
jax: 0.10.0
libtpu: 0.0.40
codegen_flags: <defaults>
</compile_context>

<pallas_src>
import functools

import jax
import jax.numpy as jnp
from jax.experimental import pallas as pl
from jax.experimental.pallas import tpu as pltpu


def _maybe_cast(a, dt):
    return a if dt is None else a.astype(dt)


# ----------------------------- Pallas kernels -----------------------------

def _shift_qkv_kernel(x_ref, w_ref, o_ref, *, disp, matmul_dtype):
    # x_ref: (n_h, n_w, C), w_ref: (C, 3C), o_ref: (n_h, n_w, 3C)
    n_h, n_w, c = x_ref.shape
    x2 = x_ref[...].reshape(n_h * n_w, c)
    y = jnp.dot(_maybe_cast(x2, matmul_dtype), _maybe_cast(w_ref[...], matmul_dtype),
                preferred_element_type=jnp.float32)
    y3 = y.astype(o_ref.dtype).reshape(n_h, n_w, y.shape[-1])
    if disp == 0:
        o_ref[...] = y3
    else:
        # cyclic_shift(-disp): out[i, j] = y3[(i + disp) % n_h, (j + disp) % n_w]
        # (per-pixel matmul commutes with the spatial roll, so shifting the projected
        #  result equals projecting the shifted input)
        o_ref[:n_h - disp, :n_w - disp, :] = y3[disp:, disp:, :]
        o_ref[:n_h - disp, n_w - disp:, :] = y3[disp:, :disp, :]
        o_ref[n_h - disp:, :n_w - disp, :] = y3[:disp, disp:, :]
        o_ref[n_h - disp:, n_w - disp:, :] = y3[:disp, :disp, :]


def _window_attn_kernel(qkv_ref, bias_ref, o_ref, *, heads, scale, matmul_dtype):
    # qkv_ref: (NW, WS2, 3C)  lane-dense (heads folded into channels)
    # bias_ref: (NW, WS2, WS2) = pos_emb + per-window shifted masks (precombined)
    # o_ref:   (NW, WS2, C)   lane-dense output
    c = o_ref.shape[-1]
    d = c // heads
    qkv = qkv_ref[...]
    bias = bias_ref[...].astype(jnp.float32)
    for h in range(heads):
        q = _maybe_cast(qkv[:, :, h * d:(h + 1) * d], matmul_dtype)
        k = _maybe_cast(qkv[:, :, c + h * d:c + (h + 1) * d], matmul_dtype)
        v = _maybe_cast(qkv[:, :, 2 * c + h * d:2 * c + (h + 1) * d], matmul_dtype)
        dots = jnp.einsum('wid,wjd->wij', q, k,
                          preferred_element_type=jnp.float32) * scale + bias
        m = jnp.max(dots, axis=-1, keepdims=True)
        e = jnp.exp(dots - m)
        attn = e * pl.reciprocal(jnp.sum(e, axis=-1, keepdims=True), approx=True)
        out_h = jnp.einsum('wij,wjd->wid', _maybe_cast(attn, matmul_dtype), v,
                           preferred_element_type=jnp.float32)
        o_ref[:, :, h * d:(h + 1) * d] = out_h.astype(o_ref.dtype)


def _out_proj_kernel(x_ref, w_ref, b_ref, o_ref, *, disp, matmul_dtype):
    # x_ref: (n_h, n_w, C), w_ref: (C, C), b_ref: (1, C), o_ref: (n_h, n_w, C)
    n_h, n_w, c = x_ref.shape
    x2 = x_ref[...].reshape(n_h * n_w, c)
    y = jnp.dot(_maybe_cast(x2, matmul_dtype), _maybe_cast(w_ref[...], matmul_dtype),
                preferred_element_type=jnp.float32) + b_ref[...].astype(jnp.float32)
    y3 = y.astype(o_ref.dtype).reshape(n_h, n_w, -1)
    if disp == 0:
        o_ref[...] = y3
    else:
        # cyclic_shift(+disp): out[i, j] = y3[(i - disp) % n_h, (j - disp) % n_w]
        o_ref[disp:, disp:, :] = y3[:n_h - disp, :n_w - disp, :]
        o_ref[disp:, :disp, :] = y3[:n_h - disp, n_w - disp:, :]
        o_ref[:disp, disp:, :] = y3[n_h - disp:, :n_w - disp, :]
        o_ref[:disp, :disp, :] = y3[n_h - disp:, n_w - disp:, :]


# ----------------------------- Pallas wrappers -----------------------------

def shift_qkv(x, w_qkv, *, disp, matmul_dtype=None):
    B, n_h, n_w, C = x.shape
    C3 = w_qkv.shape[1]
    kern = functools.partial(_shift_qkv_kernel, disp=disp, matmul_dtype=matmul_dtype)
    return pl.pallas_call(
        kern,
        out_shape=jax.ShapeDtypeStruct((B, n_h, n_w, C3), x.dtype),
        grid=(B,),
        in_specs=[pl.BlockSpec((None, n_h, n_w, C), lambda b: (b, 0, 0, 0)),
                  pl.BlockSpec((C, C3), lambda b: (0, 0))],
        out_specs=pl.BlockSpec((None, n_h, n_w, C3), lambda b: (b, 0, 0, 0)),
        compiler_params=pltpu.CompilerParams(dimension_semantics=("parallel",)),
    )(x, w_qkv)


def window_attention(qkv_win, bias, *, heads, matmul_dtype=None):
    B, NW, WS2, C3 = qkv_win.shape
    C = C3 // 3
    d = C // heads
    scale = float(d) ** -0.5
    kern = functools.partial(_window_attn_kernel, heads=heads, scale=scale,
                             matmul_dtype=matmul_dtype)
    return pl.pallas_call(
        kern,
        out_shape=jax.ShapeDtypeStruct((B, NW, WS2, C), qkv_win.dtype),
        grid=(B,),
        in_specs=[pl.BlockSpec((None, NW, WS2, C3), lambda b: (b, 0, 0, 0)),
                  pl.BlockSpec((NW, WS2, WS2), lambda b: (0, 0, 0))],
        out_specs=pl.BlockSpec((None, NW, WS2, C), lambda b: (b, 0, 0, 0)),
        compiler_params=pltpu.CompilerParams(dimension_semantics=("parallel",)),
    )(qkv_win, bias)


def out_proj_shift(x, w_out, b_out, *, disp, matmul_dtype=None):
    B, n_h, n_w, C = x.shape
    Cout = w_out.shape[1]
    kern = functools.partial(_out_proj_kernel, disp=disp, matmul_dtype=matmul_dtype)
    return pl.pallas_call(
        kern,
        out_shape=jax.ShapeDtypeStruct((B, n_h, n_w, Cout), x.dtype),
        grid=(B,),
        in_specs=[pl.BlockSpec((None, n_h, n_w, C), lambda b: (b, 0, 0, 0)),
                  pl.BlockSpec((C, Cout), lambda b: (0, 0)),
                  pl.BlockSpec((1, Cout), lambda b: (0, 0))],
        out_specs=pl.BlockSpec((None, n_h, n_w, Cout), lambda b: (b, 0, 0, 0)),
        compiler_params=pltpu.CompilerParams(dimension_semantics=("parallel",)),
    )(x, w_out, b_out.reshape(1, Cout))


# ----------------------------- W-MSA forward (spec: torch W_MSA.forward) -----------------------------

def create_mask(window_size, displacement, upper_lower, left_right):
    ws2 = window_size ** 2
    mask = jnp.zeros((ws2, ws2), jnp.float32)
    if upper_lower:
        mask = mask.at[-displacement * window_size:, :-displacement * window_size].set(-jnp.inf)
        mask = mask.at[:-displacement * window_size, -displacement * window_size:].set(-jnp.inf)
    if left_right:
        mask = mask.reshape(window_size, window_size, window_size, window_size)
        mask = mask.at[:, -displacement:, :, :-displacement].set(-jnp.inf)
        mask = mask.at[:, :-displacement, :, -displacement:].set(-jnp.inf)
        mask = mask.reshape(ws2, ws2)
    return mask


def w_msa_forward(x, params, *, heads, window_size, shifted, matmul_dtype=None):
    B, n_h, n_w, C = x.shape
    assert C % heads == 0
    ws = window_size
    nw_h, nw_w = n_h // ws, n_w // ws
    nw, ws2 = nw_h * nw_w, ws * ws
    disp = ws // 2 if shifted else 0

    # 1) fused cyclic shift (-disp) + QKV projection (no bias), one program per image
    qkv = shift_qkv(x, params['w_qkv'], disp=disp, matmul_dtype=matmul_dtype)   # (B, n_h, n_w, 3C)

    # 2) window partition (pure layout shuffle, heads stay folded -> lane-dense)
    qkv_win = qkv.reshape(B, nw_h, ws, nw_w, ws, 3 * C)
    qkv_win = qkv_win.transpose(0, 1, 3, 2, 4, 5).reshape(B, nw, ws2, 3 * C)

    # 3) precombine pos_emb + shifted edge masks into a per-window additive bias
    bias = jnp.broadcast_to(params['pos_emb'][None].astype(jnp.float32), (nw, ws2, ws2))
    if shifted:
        w_idx = jnp.arange(nw)
        is_bottom = (w_idx >= nw - nw_w)[:, None, None]          # last row of windows
        is_right = ((w_idx % nw_w) == (nw_w - 1))[:, None, None]  # rightmost column of windows
        bias = bias + jnp.where(is_bottom, params['ul_mask'][None], 0.0)
        bias = bias + jnp.where(is_right, params['lr_mask'][None], 0.0)

    # 4) window attention: all heads + windows batched per program, lane-dense in/out
    out_win = window_attention(qkv_win, bias, heads=heads, matmul_dtype=matmul_dtype)  # (B, nw, ws2, C)

    # 5) window merge (pure layout shuffle)
    out = out_win.reshape(B, nw_h, nw_w, ws, ws, C)
    out = out.transpose(0, 1, 3, 2, 4, 5).reshape(B, n_h, n_w, C)

    # 6) fused output projection + back cyclic shift (+disp)
    return out_proj_shift(out, params['w_out'], params['b_out'], disp=disp,
                          matmul_dtype=matmul_dtype)


# ----------------------------- main -----------------------------

if __name__ == "__main__":
    dim, heads, window_size = 32, 4, 4
    B, n_h, n_w = 2, 8, 8
    shifted = True

    key = jax.random.PRNGKey(0)
    keys = jax.random.split(key, 6)
    ws2 = window_size ** 2
    disp = window_size // 2
    params = {
        'w_qkv': jax.random.normal(keys[0], (dim, 3 * dim), jnp.float32) * 0.02,
        'w_out': jax.random.normal(keys[1], (dim, dim), jnp.float32) * 0.02,
        'b_out': jax.random.normal(keys[2], (dim,), jnp.float32) * 0.02,
        'pos_emb': jax.random.normal(keys[3], (ws2, ws2), jnp.float32),
        'ul_mask': create_mask(window_size, disp, upper_lower=True, left_right=False),
        'lr_mask': create_mask(window_size, disp, upper_lower=False, left_right=True),
    }
    x = jax.random.normal(keys[4], (B, n_h, n_w, dim), jnp.float32)

    # matmul_dtype=jnp.bfloat16 feeds bf16 operands to the MXU on v6e/v7x (f32 accumulation);
    # default None keeps exact f32 reference numerics.
    fwd = jax.jit(functools.partial(w_msa_forward, heads=heads,
                                    window_size=window_size, shifted=shifted,
                                    matmul_dtype=None))
    out = fwd(x, params)
    jax.block_until_ready(out)
    assert out.shape == (B, n_h, n_w, dim) and out.dtype == jnp.float32
    assert bool(jnp.all(jnp.isfinite(out)))
    print("KERNEL_OK")
</pallas_src>

<mosaic_0001>
module attributes {stable_mosaic.version = 11 : i64} {
  func.func @_shift_qkv_kernel(%arg0: i32, %arg1: memref<1x8x8x32xf32, #tpu.memory_space<vmem>>, %arg2: memref<32x96xf32, #tpu.memory_space<vmem>>, %arg3: memref<1x8x8x96xf32, #tpu.memory_space<vmem>>) attributes {dimension_semantics = [#tpu.dimension_semantics<parallel>], iteration_bounds = array<i64: 2>, scalar_prefetch = 0 : i64, scratch_operands = 0 : i64, tpu.core_type = #tpu.core_type<tc>, window_params = [{transform_indices = @transform_0, window_bounds = array<i64: 1, 8, 8, 32>}, {pipeline_mode = #tpu.pipeline_mode<synchronous>, transform_indices = @transform_1, window_bounds = array<i64: 32, 96>}, {transform_indices = @transform_2, window_bounds = array<i64: 1, 8, 8, 96>}]} {
    %c0 = arith.constant 0 : index
    %c0_0 = arith.constant 0 : index
    %c0_1 = arith.constant 0 : index
    %c0_2 = arith.constant 0 : index
    %0 = vector.load %arg1[%c0, %c0_0, %c0_1, %c0_2] : memref<1x8x8x32xf32, #tpu.memory_space<vmem>>, vector<1x8x8x32xf32>
    %1 = vector.shape_cast %0 : vector<1x8x8x32xf32> to vector<8x8x32xf32>
    %2 = vector.shape_cast %1 : vector<8x8x32xf32> to vector<64x32xf32>
    %c0_3 = arith.constant 0 : index
    %c0_4 = arith.constant 0 : index
    %3 = vector.load %arg2[%c0_3, %c0_4] : memref<32x96xf32, #tpu.memory_space<vmem>>, vector<32x96xf32>
    %cst = arith.constant dense<0.000000e+00> : vector<64x96xf32>
    %4 = tpu.matmul %2, %3, %cst {dimension_numbers = #tpu.dot_dimension_numbers<[1], [0], [0], [1], [0, 0, 1, 1], [], []>} : vector<64x32xf32>, vector<32x96xf32>, vector<64x96xf32> -> vector<64x96xf32>
    %5 = vector.shape_cast %4 : vector<64x96xf32> to vector<8x8x96xf32>
    %6 = vector.extract_strided_slice %5 {offsets = [2, 2, 0], sizes = [6, 6, 96], strides = [1, 1, 1]} : vector<8x8x96xf32> to vector<6x6x96xf32>
    %c0_5 = arith.constant 0 : index
    %c0_6 = arith.constant 0 : index
    %c0_7 = arith.constant 0 : index
    %c0_8 = arith.constant 0 : index
    %7 = vector.load %arg3[%c0_5, %c0_6, %c0_7, %c0_8] : memref<1x8x8x96xf32, #tpu.memory_space<vmem>>, vector<1x6x6x96xf32>
    %8 = vector.shape_cast %7 : vector<1x6x6x96xf32> to vector<6x6x96xf32>
    %9 = vector.shape_cast %6 : vector<6x6x96xf32> to vector<1x6x6x96xf32>
    tpu.vector_store %arg3[%c0_5, %c0_6, %c0_7, %c0_8], %9 {strides = array<i32>} : memref<1x8x8x96xf32, #tpu.memory_space<vmem>>, vector<1x6x6x96xf32>,
    %10 = vector.extract_strided_slice %5 {offsets = [2, 0, 0], sizes = [6, 2, 96], strides = [1, 1, 1]} : vector<8x8x96xf32> to vector<6x2x96xf32>
    %c0_9 = arith.constant 0 : index
    %c0_10 = arith.constant 0 : index
    %c6 = arith.constant 6 : index
    %c0_11 = arith.constant 0 : index
    %11 = vector.load %arg3[%c0_9, %c0_10, %c6, %c0_11] : memref<1x8x8x96xf32, #tpu.memory_space<vmem>>, vector<1x6x2x96xf32>
    %12 = vector.shape_cast %11 : vector<1x6x2x96xf32> to vector<6x2x96xf32>
    %13 = vector.shape_cast %10 : vector<6x2x96xf32> to vector<1x6x2x96xf32>
    tpu.vector_store %arg3[%c0_9, %c0_10, %c6, %c0_11], %13 {strides = array<i32>} : memref<1x8x8x96xf32, #tpu.memory_space<vmem>>, vector<1x6x2x96xf32>,
    %14 = vector.extract_strided_slice %5 {offsets = [0, 2, 0], sizes = [2, 6, 96], strides = [1, 1, 1]} : vector<8x8x96xf32> to vector<2x6x96xf32>
    %c0_12 = arith.constant 0 : index
    %c6_13 = arith.constant 6 : index
    %c0_14 = arith.constant 0 : index
    %c0_15 = arith.constant 0 : index
    %15 = vector.load %arg3[%c0_12, %c6_13, %c0_14, %c0_15] : memref<1x8x8x96xf32, #tpu.memory_space<vmem>>, vector<1x2x6x96xf32>
    %16 = vector.shape_cast %15 : vector<1x2x6x96xf32> to vector<2x6x96xf32>
    %17 = vector.shape_cast %14 : vector<2x6x96xf32> to vector<1x2x6x96xf32>
    tpu.vector_store %arg3[%c0_12, %c6_13, %c0_14, %c0_15], %17 {strides = array<i32>} : memref<1x8x8x96xf32, #tpu.memory_space<vmem>>, vector<1x2x6x96xf32>,
    %18 = vector.extract_strided_slice %5 {offsets = [0, 0, 0], sizes = [2, 2, 96], strides = [1, 1, 1]} : vector<8x8x96xf32> to vector<2x2x96xf32>
    %c0_16 = arith.constant 0 : index
    %c6_17 = arith.constant 6 : index
    %c6_18 = arith.constant 6 : index
    %c0_19 = arith.constant 0 : index
    %19 = vector.load %arg3[%c0_16, %c6_17, %c6_18, %c0_19] : memref<1x8x8x96xf32, #tpu.memory_space<vmem>>, vector<1x2x2x96xf32>
    %20 = vector.shape_cast %19 : vector<1x2x2x96xf32> to vector<2x2x96xf32>
    %21 = vector.shape_cast %18 : vector<2x2x96xf32> to vector<1x2x2x96xf32>
    tpu.vector_store %arg3[%c0_16, %c6_17, %c6_18, %c0_19], %21 {strides = array<i32>} : memref<1x8x8x96xf32, #tpu.memory_space<vmem>>, vector<1x2x2x96xf32>,
    return
  }
  func.func @transform_0(%arg0: i32) -> (i32, i32, i32, i32) {
    %c0_i32 = arith.constant 0 : i32
    %c0_i32_0 = arith.constant 0 : i32
    %c0_i32_1 = arith.constant 0 : i32
    %c0_i32_2 = arith.constant 0 : i32
    return %arg0, %c0_i32, %c0_i32_0, %c0_i32_1 : i32, i32, i32, i32
  }
  func.func @transform_1(%arg0: i32) -> (i32, i32) {
    %c0_i32 = arith.constant 0 : i32
    %c0_i32_0 = arith.constant 0 : i32
    %c0_i32_1 = arith.constant 0 : i32
    return %c0_i32, %c0_i32_0 : i32, i32
  }
  func.func @transform_2(%arg0: i32) -> (i32, i32, i32, i32) {
    %c0_i32 = arith.constant 0 : i32
    %c0_i32_0 = arith.constant 0 : i32
    %c0_i32_1 = arith.constant 0 : i32
    %c0_i32_2 = arith.constant 0 : i32
    return %arg0, %c0_i32, %c0_i32_0, %c0_i32_1 : i32, i32, i32, i32
  }
}

module attributes {stable_mosaic.version = 11 : i64} {
  func.func @_window_attn_kernel(%arg0: i32, %arg1: memref<1x4x16x96xf32, #tpu.memory_space<vmem>>, %arg2: memref<4x16x16xf32, #tpu.memory_space<vmem>>, %arg3: memref<1x4x16x32xf32, #tpu.memory_space<vmem>>) attributes {dimension_semantics = [#tpu.dimension_semantics<parallel>], iteration_bounds = array<i64: 2>, scalar_prefetch = 0 : i64, scratch_operands = 0 : i64, tpu.core_type = #tpu.core_type<tc>, window_params = [{transform_indices = @transform_0, window_bounds = array<i64: 1, 4, 16, 96>}, {pipeline_mode = #tpu.pipeline_mode<synchronous>, transform_indices = @transform_1, window_bounds = array<i64: 4, 16, 16>}, {transform_indices = @transform_2, window_bounds = array<i64: 1, 4, 16, 32>}]} {
    %c0 = arith.constant 0 : index
    %c0_0 = arith.constant 0 : index
    %c0_1 = arith.constant 0 : index
    %c0_2 = arith.constant 0 : index
    %0 = vector.load %arg1[%c0, %c0_0, %c0_1, %c0_2] : memref<1x4x16x96xf32, #tpu.memory_space<vmem>>, vector<1x4x16x96xf32>
    %1 = vector.shape_cast %0 : vector<1x4x16x96xf32> to vector<4x16x96xf32>
    %c0_3 = arith.constant 0 : index
    %c0_4 = arith.constant 0 : index
    %c0_5 = arith.constant 0 : index
    %2 = vector.load %arg2[%c0_3, %c0_4, %c0_5] : memref<4x16x16xf32, #tpu.memory_space<vmem>>, vector<4x16x16xf32>
    %3 = vector.extract_strided_slice %1 {offsets = [0, 0, 0], sizes = [4, 16, 8], strides = [1, 1, 1]} : vector<4x16x96xf32> to vector<4x16x8xf32>
    %4 = vector.extract_strided_slice %1 {offsets = [0, 0, 32], sizes = [4, 16, 8], strides = [1, 1, 1]} : vector<4x16x96xf32> to vector<4x16x8xf32>
    %5 = vector.extract_strided_slice %1 {offsets = [0, 0, 64], sizes = [4, 16, 8], strides = [1, 1, 1]} : vector<4x16x96xf32> to vector<4x16x8xf32>
    "tpu.trace_start"() <{level = 10 : i32, message = "wid,wjd->wij"}> : () -> ()
    %cst = arith.constant dense<0.000000e+00> : vector<4x16x16xf32>
    %6 = tpu.matmul %3, %4, %cst {dimension_numbers = #tpu.dot_dimension_numbers<[2], [2], [1], [1], [0, 0, 0, 1, 1, 1], [0], [0]>} : vector<4x16x8xf32>, vector<4x16x8xf32>, vector<4x16x16xf32> -> vector<4x16x16xf32>
    "tpu.trace_stop"() : () -> ()
    %cst_6 = arith.constant 0.353553385 : f32
    %7 = vector.broadcast %cst_6 : f32 to vector<4x16x16xf32>
    %8 = arith.mulf %6, %7 : vector<4x16x16xf32>
    %9 = arith.addf %8, %2 : vector<4x16x16xf32>
    %cst_7 = arith.constant dense<0xFF800000> : vector<4x16xf32>
    %10 = vector.multi_reduction <maximumf>, %9, %cst_7 [2] : vector<4x16x16xf32> to vector<4x16xf32>
    %11 = vector.shape_cast %10 : vector<4x16xf32> to vector<4x16x1xf32>
    %12 = vector.broadcast %11 : vector<4x16x1xf32> to vector<4x16x16xf32>
    %13 = arith.subf %9, %12 : vector<4x16x16xf32>
    %14 = math.exp %13 : vector<4x16x16xf32>
    %cst_8 = arith.constant dense<0.000000e+00> : vector<4x16xf32>
    %15 = vector.multi_reduction <add>, %14, %cst_8 [2] : vector<4x16x16xf32> to vector<4x16xf32>
    %16 = vector.shape_cast %15 : vector<4x16xf32> to vector<4x16x1xf32>
    %17 = tpu.reciprocal %16 {approx = true} : vector<4x16x1xf32> -> vector<4x16x1xf32>
    %18 = vector.broadcast %17 : vector<4x16x1xf32> to vector<4x16x16xf32>
    %19 = arith.mulf %14, %18 : vector<4x16x16xf32>
    "tpu.trace_start"() <{level = 10 : i32, message = "wij,wjd->wid"}> : () -> ()
    %cst_9 = arith.constant dense<0.000000e+00> : vector<4x16x8xf32>
    %20 = tpu.matmul %19, %5, %cst_9 {dimension_numbers = #tpu.dot_dimension_numbers<[2], [1], [1], [2], [0, 0, 0, 1, 1, 2], [0], [0]>} : vector<4x16x16xf32>, vector<4x16x8xf32>, vector<4x16x8xf32> -> vector<4x16x8xf32>
    "tpu.trace_stop"() : () -> ()
    %c0_10 = arith.constant 0 : index
    %c0_11 = arith.constant 0 : index
    %c0_12 = arith.constant 0 : index
    %c0_13 = arith.constant 0 : index
    %21 = vector.load %arg3[%c0_10, %c0_11, %c0_12, %c0_13] : memref<1x4x16x32xf32, #tpu.memory_space<vmem>>, vector<1x4x16x8xf32>
    %22 = vector.shape_cast %21 : vector<1x4x16x8xf32> to vector<4x16x8xf32>
    %23 = vector.shape_cast %20 : vector<4x16x8xf32> to vector<1x4x16x8xf32>
    tpu.vector_store %arg3[%c0_10, %c0_11, %c0_12, %c0_13], %23 {strides = array<i32>} : memref<1x4x16x32xf32, #tpu.memory_space<vmem>>, vector<1x4x16x8xf32>,
    %24 = vector.extract_strided_slice %1 {offsets = [0, 0, 8], sizes = [4, 16, 8], strides = [1, 1, 1]} : vector<4x16x96xf32> to vector<4x16x8xf32>
    %25 = vector.extract_strided_slice %1 {offsets = [0, 0, 40], sizes = [4, 16, 8], strides = [1, 1, 1]} : vector<4x16x96xf32> to vector<4x16x8xf32>
    %26 = vector.extract_strided_slice %1 {offsets = [0, 0, 72], sizes = [4, 16, 8], strides = [1, 1, 1]} : vector<4x16x96xf32> to vector<4x16x8xf32>
    "tpu.trace_start"() <{level = 10 : i32, message = "wid,wjd->wij"}> : () -> ()
    %cst_14 = arith.constant dense<0.000000e+00> : vector<4x16x16xf32>
    %27 = tpu.matmul %24, %25, %cst_14 {dimension_numbers = #tpu.dot_dimension_numbers<[2], [2], [1], [1], [0, 0, 0, 1, 1, 1], [0], [0]>} : vector<4x16x8xf32>, vector<4x16x8xf32>, vector<4x16x16xf32> -> vector<4x16x16xf32>
    "tpu.trace_stop"() : () -> ()
    %cst_15 = arith.constant 0.353553385 : f32
    %28 = vector.broadcast %cst_15 : f32 to vector<4x16x16xf32>
    %29 = arith.mulf %27, %28 : vector<4x16x16xf32>
    %30 = arith.addf %29, %2 : vector<4x16x16xf32>
    %cst_16 = arith.constant dense<0xFF800000> : vector<4x16xf32>
    %31 = vector.multi_reduction <maximumf>, %30, %cst_16 [2] : vector<4x16x16xf32> to vector<4x16xf32>
    %32 = vector.shape_cast %31 : vector<4x16xf32> to vector<4x16x1xf32>
    %33 = vector.broadcast %32 : vector<4x16x1xf32> to vector<4x16x16xf32>
    %34 = arith.subf %30, %33 : vector<4x16x16xf32>
    %35 = math.exp %34 : vector<4x16x16xf32>
    %cst_17 = arith.constant dense<0.000000e+00> : vector<4x16xf32>
    %36 = vector.multi_reduction <add>, %35, %cst_17 [2] : vector<4x16x16xf32> to vector<4x16xf32>
    %37 = vector.shape_cast %36 : vector<4x16xf32> to vector<4x16x1xf32>
    %38 = tpu.reciprocal %37 {approx = true} : vector<4x16x1xf32> -> vector<4x16x1xf32>
    %39 = vector.broadcast %38 : vector<4x16x1xf32> to vector<4x16x16xf32>
    %40 = arith.mulf %35, %39 : vector<4x16x16xf32>
    "tpu.trace_start"() <{level = 10 : i32, message = "wij,wjd->wid"}> : () -> ()
    %cst_18 = arith.constant dense<0.000000e+00> : vector<4x16x8xf32>
    %41 = tpu.matmul %40, %26, %cst_18 {dimension_numbers = #tpu.dot_dimension_numbers<[2], [1], [1], [2], [0, 0, 0, 1, 1, 2], [0], [0]>} : vector<4x16x16xf32>, vector<4x16x8xf32>, vector<4x16x8xf32> -> vector<4x16x8xf32>
    "tpu.trace_stop"() : () -> ()
    %c0_19 = arith.constant 0 : index
    %c0_20 = arith.constant 0 : index
    %c0_21 = arith.constant 0 : index
    %c8 = arith.constant 8 : index
    %42 = vector.load %arg3[%c0_19, %c0_20, %c0_21, %c8] : memref<1x4x16x32xf32, #tpu.memory_space<vmem>>, vector<1x4x16x8xf32>
    %43 = vector.shape_cast %42 : vector<1x4x16x8xf32> to vector<4x16x8xf32>
    %44 = vector.shape_cast %41 : vector<4x16x8xf32> to vector<1x4x16x8xf32>
    tpu.vector_store %arg3[%c0_19, %c0_20, %c0_21, %c8], %44 {strides = array<i32>} : memref<1x4x16x32xf32, #tpu.memory_space<vmem>>, vector<1x4x16x8xf32>,
    %45 = vector.extract_strided_slice %1 {offsets = [0, 0, 16], sizes = [4, 16, 8], strides = [1, 1, 1]} : vector<4x16x96xf32> to vector<4x16x8xf32>
    %46 = vector.extract_strided_slice %1 {offsets = [0, 0, 48], sizes = [4, 16, 8], strides = [1, 1, 1]} : vector<4x16x96xf32> to vector<4x16x8xf32>
    %47 = vector.extract_strided_slice %1 {offsets = [0, 0, 80], sizes = [4, 16, 8], strides = [1, 1, 1]} : vector<4x16x96xf32> to vector<4x16x8xf32>
    "tpu.trace_start"() <{level = 10 : i32, message = "wid,wjd->wij"}> : () -> ()
    %cst_22 = arith.constant dense<0.000000e+00> : vector<4x16x16xf32>
    %48 = tpu.matmul %45, %46, %cst_22 {dimension_numbers = #tpu.dot_dimension_numbers<[2], [2], [1], [1], [0, 0, 0, 1, 1, 1], [0], [0]>} : vector<4x16x8xf32>, vector<4x16x8xf32>, vector<4x16x16xf32> -> vector<4x16x16xf32>
    "tpu.trace_stop"() : () -> ()
    %cst_23 = arith.constant 0.353553385 : f32
    %49 = vector.broadcast %cst_23 : f32 to vector<4x16x16xf32>
    %50 = arith.mulf %48, %49 : vector<4x16x16xf32>
    %51 = arith.addf %50, %2 : vector<4x16x16xf32>
    %cst_24 = arith.constant dense<0xFF800000> : vector<4x16xf32>
    %52 = vector.multi_reduction <maximumf>, %51, %cst_24 [2] : vector<4x16x16xf32> to vector<4x16xf32>
    %53 = vector.shape_cast %52 : vector<4x16xf32> to vector<4x16x1xf32>
    %54 = vector.broadcast %53 : vector<4x16x1xf32> to vector<4x16x16xf32>
    %55 = arith.subf %51, %54 : vector<4x16x16xf32>
    %56 = math.exp %55 : vector<4x16x16xf32>
    %cst_25 = arith.constant dense<0.000000e+00> : vector<4x16xf32>
    %57 = vector.multi_reduction <add>, %56, %cst_25 [2] : vector<4x16x16xf32> to vector<4x16xf32>
    %58 = vector.shape_cast %57 : vector<4x16xf32> to vector<4x16x1xf32>
    %59 = tpu.reciprocal %58 {approx = true} : vector<4x16x1xf32> -> vector<4x16x1xf32>
    %60 = vector.broadcast %59 : vector<4x16x1xf32> to vector<4x16x16xf32>
    %61 = arith.mulf %56, %60 : vector<4x16x16xf32>
    "tpu.trace_start"() <{level = 10 : i32, message = "wij,wjd->wid"}> : () -> ()
    %cst_26 = arith.constant dense<0.000000e+00> : vector<4x16x8xf32>
    %62 = tpu.matmul %61, %47, %cst_26 {dimension_numbers = #tpu.dot_dimension_numbers<[2], [1], [1], [2], [0, 0, 0, 1, 1, 2], [0], [0]>} : vector<4x16x16xf32>, vector<4x16x8xf32>, vector<4x16x8xf32> -> vector<4x16x8xf32>
    "tpu.trace_stop"() : () -> ()
    %c0_27 = arith.constant 0 : index
    %c0_28 = arith.constant 0 : index
    %c0_29 = arith.constant 0 : index
    %c16 = arith.constant 16 : index
    %63 = vector.load %arg3[%c0_27, %c0_28, %c0_29, %c16] : memref<1x4x16x32xf32, #tpu.memory_space<vmem>>, vector<1x4x16x8xf32>
    %64 = vector.shape_cast %63 : vector<1x4x16x8xf32> to vector<4x16x8xf32>
    %65 = vector.shape_cast %62 : vector<4x16x8xf32> to vector<1x4x16x8xf32>
    tpu.vector_store %arg3[%c0_27, %c0_28, %c0_29, %c16], %65 {strides = array<i32>} : memref<1x4x16x32xf32, #tpu.memory_space<vmem>>, vector<1x4x16x8xf32>,
    %66 = vector.extract_strided_slice %1 {offsets = [0, 0, 24], sizes = [4, 16, 8], strides = [1, 1, 1]} : vector<4x16x96xf32> to vector<4x16x8xf32>
    %67 = vector.extract_strided_slice %1 {offsets = [0, 0, 56], sizes = [4, 16, 8], strides = [1, 1, 1]} : vector<4x16x96xf32> to vector<4x16x8xf32>
    %68 = vector.extract_strided_slice %1 {offsets = [0, 0, 88], sizes = [4, 16, 8], strides = [1, 1, 1]} : vector<4x16x96xf32> to vector<4x16x8xf32>
    "tpu.trace_start"() <{level = 10 : i32, message = "wid,wjd->wij"}> : () -> ()
    %cst_30 = arith.constant dense<0.000000e+00> : vector<4x16x16xf32>
    %69 = tpu.matmul %66, %67, %cst_30 {dimension_numbers = #tpu.dot_dimension_numbers<[2], [2], [1], [1], [0, 0, 0, 1, 1, 1], [0], [0]>} : vector<4x16x8xf32>, vector<4x16x8xf32>, vector<4x16x16xf32> -> vector<4x16x16xf32>
    "tpu.trace_stop"() : () -> ()
    %cst_31 = arith.constant 0.353553385 : f32
    %70 = vector.broadcast %cst_31 : f32 to vector<4x16x16xf32>
    %71 = arith.mulf %69, %70 : vector<4x16x16xf32>
    %72 = arith.addf %71, %2 : vector<4x16x16xf32>
    %cst_32 = arith.constant dense<0xFF800000> : vector<4x16xf32>
    %73 = vector.multi_reduction <maximumf>, %72, %cst_32 [2] : vector<4x16x16xf32> to vector<4x16xf32>
    %74 = vector.shape_cast %73 : vector<4x16xf32> to vector<4x16x1xf32>
    %75 = vector.broadcast %74 : vector<4x16x1xf32> to vector<4x16x16xf32>
    %76 = arith.subf %72, %75 : vector<4x16x16xf32>
    %77 = math.exp %76 : vector<4x16x16xf32>
    %cst_33 = arith.constant dense<0.000000e+00> : vector<4x16xf32>
    %78 = vector.multi_reduction <add>, %77, %cst_33 [2] : vector<4x16x16xf32> to vector<4x16xf32>
    %79 = vector.shape_cast %78 : vector<4x16xf32> to vector<4x16x1xf32>
    %80 = tpu.reciprocal %79 {approx = true} : vector<4x16x1xf32> -> vector<4x16x1xf32>
    %81 = vector.broadcast %80 : vector<4x16x1xf32> to vector<4x16x16xf32>
    %82 = arith.mulf %77, %81 : vector<4x16x16xf32>
    "tpu.trace_start"() <{level = 10 : i32, message = "wij,wjd->wid"}> : () -> ()
    %cst_34 = arith.constant dense<0.000000e+00> : vector<4x16x8xf32>
    %83 = tpu.matmul %82, %68, %cst_34 {dimension_numbers = #tpu.dot_dimension_numbers<[2], [1], [1], [2], [0, 0, 0, 1, 1, 2], [0], [0]>} : vector<4x16x16xf32>, vector<4x16x8xf32>, vector<4x16x8xf32> -> vector<4x16x8xf32>
    "tpu.trace_stop"() : () -> ()
    %c0_35 = arith.constant 0 : index
    %c0_36 = arith.constant 0 : index
    %c0_37 = arith.constant 0 : index
    %c24 = arith.constant 24 : index
    %84 = vector.load %arg3[%c0_35, %c0_36, %c0_37, %c24] : memref<1x4x16x32xf32, #tpu.memory_space<vmem>>, vector<1x4x16x8xf32>
    %85 = vector.shape_cast %84 : vector<1x4x16x8xf32> to vector<4x16x8xf32>
    %86 = vector.shape_cast %83 : vector<4x16x8xf32> to vector<1x4x16x8xf32>
    tpu.vector_store %arg3[%c0_35, %c0_36, %c0_37, %c24], %86 {strides = array<i32>} : memref<1x4x16x32xf32, #tpu.memory_space<vmem>>, vector<1x4x16x8xf32>,
    return
  }
  func.func @transform_0(%arg0: i32) -> (i32, i32, i32, i32) {
    %c0_i32 = arith.constant 0 : i32
    %c0_i32_0 = arith.constant 0 : i32
    %c0_i32_1 = arith.constant 0 : i32
    %c0_i32_2 = arith.constant 0 : i32
    return %arg0, %c0_i32, %c0_i32_0, %c0_i32_1 : i32, i32, i32, i32
  }
  func.func @transform_1(%arg0: i32) -> (i32, i32, i32) {
    %c0_i32 = arith.constant 0 : i32
    %c0_i32_0 = arith.constant 0 : i32
    %c0_i32_1 = arith.constant 0 : i32
    %c0_i32_2 = arith.constant 0 : i32
    return %c0_i32, %c0_i32_0, %c0_i32_1 : i32, i32, i32
  }
  func.func @transform_2(%arg0: i32) -> (i32, i32, i32, i32) {
    %c0_i32 = arith.constant 0 : i32
    %c0_i32_0 = arith.constant 0 : i32
    %c0_i32_1 = arith.constant 0 : i32
    %c0_i32_2 = arith.constant 0 : i32
    return %arg0, %c0_i32, %c0_i32_0, %c0_i32_1 : i32, i32, i32, i32
  }
}

module attributes {stable_mosaic.version = 11 : i64} {
  func.func @_out_proj_kernel(%arg0: i32, %arg1: memref<1x8x8x32xf32, #tpu.memory_space<vmem>>, %arg2: memref<32x32xf32, #tpu.memory_space<vmem>>, %arg3: memref<1x32xf32, #tpu.memory_space<vmem>>, %arg4: memref<1x8x8x32xf32, #tpu.memory_space<vmem>>) attributes {dimension_semantics = [#tpu.dimension_semantics<parallel>], iteration_bounds = array<i64: 2>, scalar_prefetch = 0 : i64, scratch_operands = 0 : i64, tpu.core_type = #tpu.core_type<tc>, window_params = [{transform_indices = @transform_0, window_bounds = array<i64: 1, 8, 8, 32>}, {pipeline_mode = #tpu.pipeline_mode<synchronous>, transform_indices = @transform_1, window_bounds = array<i64: 32, 32>}, {pipeline_mode = #tpu.pipeline_mode<synchronous>, transform_indices = @transform_2, window_bounds = array<i64: 1, 32>}, {transform_indices = @transform_3, window_bounds = array<i64: 1, 8, 8, 32>}]} {
    %c0 = arith.constant 0 : index
    %c0_0 = arith.constant 0 : index
    %c0_1 = arith.constant 0 : index
    %c0_2 = arith.constant 0 : index
    %0 = vector.load %arg1[%c0, %c0_0, %c0_1, %c0_2] : memref<1x8x8x32xf32, #tpu.memory_space<vmem>>, vector<1x8x8x32xf32>
    %1 = vector.shape_cast %0 : vector<1x8x8x32xf32> to vector<8x8x32xf32>
    %2 = vector.shape_cast %1 : vector<8x8x32xf32> to vector<64x32xf32>
    %c0_3 = arith.constant 0 : index
    %c0_4 = arith.constant 0 : index
    %3 = vector.load %arg2[%c0_3, %c0_4] : memref<32x32xf32, #tpu.memory_space<vmem>>, vector<32x32xf32>
    %cst = arith.constant dense<0.000000e+00> : vector<64x32xf32>
    %4 = tpu.matmul %2, %3, %cst {dimension_numbers = #tpu.dot_dimension_numbers<[1], [0], [0], [1], [0, 0, 1, 1], [], []>} : vector<64x32xf32>, vector<32x32xf32>, vector<64x32xf32> -> vector<64x32xf32>
    %c0_5 = arith.constant 0 : index
    %c0_6 = arith.constant 0 : index
    %5 = vector.load %arg3[%c0_5, %c0_6] : memref<1x32xf32, #tpu.memory_space<vmem>>, vector<1x32xf32>
    %6 = vector.broadcast %5 : vector<1x32xf32> to vector<64x32xf32>
    %7 = arith.addf %4, %6 : vector<64x32xf32>
    %8 = vector.shape_cast %7 : vector<64x32xf32> to vector<8x8x32xf32>
    %9 = vector.extract_strided_slice %8 {offsets = [0, 0, 0], sizes = [6, 6, 32], strides = [1, 1, 1]} : vector<8x8x32xf32> to vector<6x6x32xf32>
    %c0_7 = arith.constant 0 : index
    %c2 = arith.constant 2 : index
    %c2_8 = arith.constant 2 : index
    %c0_9 = arith.constant 0 : index
    %10 = vector.load %arg4[%c0_7, %c2, %c2_8, %c0_9] : memref<1x8x8x32xf32, #tpu.memory_space<vmem>>, vector<1x6x6x32xf32>
    %11 = vector.shape_cast %10 : vector<1x6x6x32xf32> to vector<6x6x32xf32>
    %12 = vector.shape_cast %9 : vector<6x6x32xf32> to vector<1x6x6x32xf32>
    tpu.vector_store %arg4[%c0_7, %c2, %c2_8, %c0_9], %12 {strides = array<i32>} : memref<1x8x8x32xf32, #tpu.memory_space<vmem>>, vector<1x6x6x32xf32>,
    %13 = vector.extract_strided_slice %8 {offsets = [0, 6, 0], sizes = [6, 2, 32], strides = [1, 1, 1]} : vector<8x8x32xf32> to vector<6x2x32xf32>
    %c0_10 = arith.constant 0 : index
    %c2_11 = arith.constant 2 : index
    %c0_12 = arith.constant 0 : index
    %c0_13 = arith.constant 0 : index
    %14 = vector.load %arg4[%c0_10, %c2_11, %c0_12, %c0_13] : memref<1x8x8x32xf32, #tpu.memory_space<vmem>>, vector<1x6x2x32xf32>
    %15 = vector.shape_cast %14 : vector<1x6x2x32xf32> to vector<6x2x32xf32>
    %16 = vector.shape_cast %13 : vector<6x2x32xf32> to vector<1x6x2x32xf32>
    tpu.vector_store %arg4[%c0_10, %c2_11, %c0_12, %c0_13], %16 {strides = array<i32>} : memref<1x8x8x32xf32, #tpu.memory_space<vmem>>, vector<1x6x2x32xf32>,
    %17 = vector.extract_strided_slice %8 {offsets = [6, 0, 0], sizes = [2, 6, 32], strides = [1, 1, 1]} : vector<8x8x32xf32> to vector<2x6x32xf32>
    %c0_14 = arith.constant 0 : index
    %c0_15 = arith.constant 0 : index
    %c2_16 = arith.constant 2 : index
    %c0_17 = arith.constant 0 : index
    %18 = vector.load %arg4[%c0_14, %c0_15, %c2_16, %c0_17] : memref<1x8x8x32xf32, #tpu.memory_space<vmem>>, vector<1x2x6x32xf32>
    %19 = vector.shape_cast %18 : vector<1x2x6x32xf32> to vector<2x6x32xf32>
    %20 = vector.shape_cast %17 : vector<2x6x32xf32> to vector<1x2x6x32xf32>
    tpu.vector_store %arg4[%c0_14, %c0_15, %c2_16, %c0_17], %20 {strides = array<i32>} : memref<1x8x8x32xf32, #tpu.memory_space<vmem>>, vector<1x2x6x32xf32>,
    %21 = vector.extract_strided_slice %8 {offsets = [6, 6, 0], sizes = [2, 2, 32], strides = [1, 1, 1]} : vector<8x8x32xf32> to vector<2x2x32xf32>
    %c0_18 = arith.constant 0 : index
    %c0_19 = arith.constant 0 : index
    %c0_20 = arith.constant 0 : index
    %c0_21 = arith.constant 0 : index
    %22 = vector.load %arg4[%c0_18, %c0_19, %c0_20, %c0_21] : memref<1x8x8x32xf32, #tpu.memory_space<vmem>>, vector<1x2x2x32xf32>
    %23 = vector.shape_cast %22 : vector<1x2x2x32xf32> to vector<2x2x32xf32>
    %24 = vector.shape_cast %21 : vector<2x2x32xf32> to vector<1x2x2x32xf32>
    tpu.vector_store %arg4[%c0_18, %c0_19, %c0_20, %c0_21], %24 {strides = array<i32>} : memref<1x8x8x32xf32, #tpu.memory_space<vmem>>, vector<1x2x2x32xf32>,
    return
  }
  func.func @transform_0(%arg0: i32) -> (i32, i32, i32, i32) {
    %c0_i32 = arith.constant 0 : i32
    %c0_i32_0 = arith.constant 0 : i32
    %c0_i32_1 = arith.constant 0 : i32
    %c0_i32_2 = arith.constant 0 : i32
    return %arg0, %c0_i32, %c0_i32_0, %c0_i32_1 : i32, i32, i32, i32
  }
  func.func @transform_1(%arg0: i32) -> (i32, i32) {
    %c0_i32 = arith.constant 0 : i32
    %c0_i32_0 = arith.constant 0 : i32
    %c0_i32_1 = arith.constant 0 : i32
    return %c0_i32, %c0_i32_0 : i32, i32
  }
  func.func @transform_2(%arg0: i32) -> (i32, i32) {
    %c0_i32 = arith.constant 0 : i32
    %c0_i32_0 = arith.constant 0 : i32
    %c0_i32_1 = arith.constant 0 : i32
    return %c0_i32, %c0_i32_0 : i32, i32
  }
  func.func @transform_3(%arg0: i32) -> (i32, i32, i32, i32) {
    %c0_i32 = arith.constant 0 : i32
    %c0_i32_0 = arith.constant 0 : i32
    %c0_i32_1 = arith.constant 0 : i32
    %c0_i32_2 = arith.constant 0 : i32
    return %arg0, %c0_i32, %c0_i32_0, %c0_i32_1 : i32, i32, i32, i32
  }
}

</mosaic_0001>

<bundles_post_ra>
// kernel: w_msa_forward.3
= control target key start
LH: loop header
LB: loop body
LE: loop exit
PB: predicated region body
PF: predicated region fallthrough
CT: control target
= control target key end

     0   :  { %7 = vsyncpa [#allocation3], 0  ;;  %s630_s0 = inlined_call_operand.hbm [shape: f32[2,8,8,32], index: 0, kind: input, shape index: {}]   ;;  %s631_s1 = inlined_call_operand.vmem [shape: f32[32,96], index: 1, kind: input, shape index: {}]   ;;  %s632_s2 = inlined_call_operand.vmem [shape: f32[2,8,8,96], index: 2, kind: output, shape index: {}]  }
   0x1   :  { %9 = vsyncpa [#allocation3 + $0x1], 0  ;;  %s492_s9 = smov 0   ;;  %s494_s10 = smov 0  }
   0x2   :  { %s496_s11 = smov 0   ;;  %s498_s12 = smov 0  }
   0x3 LB: > { %s511_s13 = sadd.s32 4294967295, %s473_s12   ;;  %s514_s14 = sadd.s32 1, %s473_s12   ;;  %s473_s12 = sphi %s498_s12, %s639_s12   ;;  %s469_s11 = sphi %s496_s11, %s638_s11   ;;  %s465_s10 = sphi %s494_s10, %s637_s10   ;;  %s461_s9 = sphi %s492_s9, %s636_s9  }
   0x4   : > { %s19_s15 = ssub.s32 %s473_s12, %s514_s14  ;;  %s22_s16 = sadd.s32 1, %s469_s11 }
   0x5   : > { %p20_p0 = scmp.eq.s32.totalorder %s19_s15, 0  ;;  %p29_p1 = scmp.ne.s32.totalorder %s469_s11, %s465_s10 }
   0x6   : > { %p30_p2 = scmp.eq.s32.totalorder %s473_s12, 0  ;;  %p35_p3 = scmp.ne.s32.totalorder %s465_s10, %s461_s9 }
   0x7   : > { %s524_s17 = scalar_select %p20_p0, %s469_s11, %s22_s16  }
   0x8   : > { %p526_p4 = por %p30_p2, %p29_p1  ;;  %p36_p5 = scmp.eq.s32.totalorder %s511_s13, 0 }
   0x9   : > { %p374_p6 = scmp.lt.s32.totalorder %s473_s12, 2  ;;  %s109_s20 = sand.u32 1, %s469_s11  }
   0xa   : > { %p532_p7 = por %p36_p5, %p35_p3  ;;  %s333_s21 = sshll.u32 %s109_s20, 6 }
   0xb   : > { %s354_s22 = sshll.u32 %s473_s12, 6  ;;  %s113_s26 = scalar_lea.vmem [#allocation2], %s333_s21 }
   0xc   : > { %s118_s25 = scalar_lea.hbm %s630_s0, %s354_s22  ;;  %s121_s27 = sshll.u32 %s113_s26, 4  ;;  %s122_s27 = int_to_ptr.vmem [resolvable:$true] %s121_s27 }
   0xd   : > { %s119_s28 = sshll.u32 %s118_s25, 4  ;;  %p543_p8 = pnand %p374_p6, %p526_p4  ;;  %s120_s28 = int_to_ptr.hbm [resolvable:$true] %s119_s28 }
   0xe   : > { %p336_p9 = scmp.ge.s32.totalorder %s473_s12, 1  ;;  %s110_s30 = scalar_lea.sflag [#allocation3], %s109_s20 }
   0xf   : > { %s409_s3 = sshra.s32 %s120_s28, 4  ;;  %p413_p11 = pneg %p543_p8  ;;  %s410_s3 = int_to_ptr.hbm [resolvable:$true] %s409_s3 }
  0x10   : > { %s411_s4 = scalar_lea.hbm %s410_s3, 64  ;;  %s416_s7 = scalar_lea.hbm %s630_s0, 128 }
  0x11   : > { %p412_p10 = scmp.ne.s32.totalorder %s410_s3, %s411_s4  ;;  %p417_p0 = scmp.lt.s32.totalorder %s410_s3, %s630_s0 }
  0x12   : > { %p418_p1 = scmp.lt.s32.totalorder %s416_s7, %s411_s4 }
  0x13   : > { %p414_p12 = pnand %p413_p11, %p412_p10 }
  0x14   : > { %p419_p2 = por %p418_p1, %p417_p0 }
  0x15   : > { %p415_p13 = pneg %p414_p12 }
  0x17   : > { %p420_p3 = pnand %p419_p2, %p415_p13 }
  0x19   : > { %423 = shalt.err (!%p420_p3)
}
  0x1a   : > { %s475_s15 = smov 128   ;;  %s476_s16 = smov 8  }
  0x1b   : > { %373 = dma.hbm_to_vmem [thread:$0]  (!%p543_p8), %s120_s28, 1024, %s122_s27, %s110_s30, %s475_s15, %s475_s15, %s476_s16  }
  0x1c   : > { %p129_p4 = scmp.lt.s32.totalorder %s473_s12, 3 }
  0x1e   : > { %p130_p5 = pnand %p336_p9, %p129_p4 }
  0x1f   : > { %s135_s18 = sand.u32 (!%p130_p5), 1, %s465_s10  }
  0x20   : > { %133 = sbr.rel (%p130_p5) target bundleno = 190 (0xbe), region = 28  ;;  %s337_s20 = sshll.u32 (!%p130_p5), %s135_s18, 6 }
  0x21   : > { %s136_s21 = scalar_lea.sflag (!%p130_p5), [#allocation3], %s135_s18  ;;  %s562_s22 = scalar_lea.vmem (!%p130_p5), [#allocation2], %s337_s20 }
  0x25   : > { %456 = dma.done.wait (%p532_p7), %s136_s21, 1024  }
  0x26   : > { %458 = vsyncadd (%p532_p7), %s136_s21, 4294966272  ;;  %v177_v0 = vld [vmem:[%s631_s1 + $0x18] sm:$0xff]  ;;  %v176_v1 = vld [vmem:[%s631_s1 + $0x10] sm:$0xff]  ;;  %vm178_vm0 = vcmask 261120   ;;  %p161_p6 = scmp.lt.s32.totalorder %s511_s13, 1  ;;  %vm244_vm1 = vcmask 785410  }
  0x27   : > { %357 = vmatpush.msra.mxu2 %v177_v0  ;;  %358 = vmatpush.msra.mxu3 %v177_v0  ;;  %v175_v2 = vld [vmem:[%s631_s1 + $0x8] sm:$0xff]  ;;  %v174_v3 = vld [vmem:[%s631_s1] sm:$0xff]  ;;  %v172_v5 = vld [vmem:[%s562_s22 + $0x30] sm:$0xff]  ;;  %vm251_vm2 = vcmask 779264  }
  0x28   : > { %215 = vmatpush.msra.mxu0 %v177_v0  ;;  %356 = vmatpush.msra.mxu1 %v177_v0  ;;  %v170_v4 = vld [vmem:[%s562_s22 + $0x20] sm:$0xff]  ;;  %v168_v7 = vld [vmem:[%s562_s22 + $0x10] sm:$0xff]  ;;  %v171_v8 = vld [vmem:[%s562_s22 + $0x28] sm:$0xff]  ;;  %s641_s13 = smov (!%p161_p6, %s511_s13), 1 }
  0x29   : > { %360 = vmatpush.msra.mxu2 %v176_v1  ;;  %361 = vmatpush.msra.mxu3 %v176_v1  ;;  %v166_v6 = vld [vmem:[%s562_s22] sm:$0xff]  ;;  %v173_v9 = vld [vmem:[%s562_s22 + $0x38] sm:$0xff]  ;;  %v167_v10 = vld [vmem:[%s562_s22 + $0x8] sm:$0xff]  ;;  %s355_s29 = sshll.u32 %s641_s13, 6 }
  0x2a   : > { %216 = vmatpush.msra.mxu0 %v176_v1  ;;  %359 = vmatpush.msra.mxu1 %v176_v1  ;;  %v169_v11 = vld [vmem:[%s562_s22 + $0x18] sm:$0xff]  ;;  %s165_s4 = scalar_lea.vmem %s632_s2, %s355_s29 }
  0x2b   : > { %363 = vmatpush.msra.mxu2 %v175_v2  ;;  %364 = vmatpush.msra.mxu3 %v175_v2 }
  0x2c   : > { %217 = vmatpush.msra.mxu0 %v175_v2  ;;  %362 = vmatpush.msra.mxu1 %v175_v2 }
  0x2d   : > { %366 = vmatpush.msra.mxu2 %v174_v3  ;;  %367 = vmatpush.msra.mxu3 %v174_v3 }
  0x2e   : > { %344 = vmatmul.msk.f32.vlgmr.msra.gmra.mxu2 %vm178_vm0, %v170_v4  ;;  %346 = vmatmul.msk.f32.vlgmr.msra.gmra.mxu3 %vm178_vm0, %v172_v5 }
  0x2f   : > { %218 = vmatpush.msra.mxu0 %v174_v3  ;;  %365 = vmatpush.msra.mxu1 %v174_v3 }
  0x30   : > { %340 = vmatmul.msk.f32.vlgmr.msra.gmra.mxu0 %vm178_vm0, %v166_v6  ;;  %342 = vmatmul.msk.f32.vlgmr.msra.gmra.mxu1 %vm178_vm0, %v168_v7 }
  0x36   : > { %345 = vmatmul.msk.f32.gmra.mxu2 %vm178_vm0, %v171_v8  ;;  %347 = vmatmul.msk.f32.gmra.mxu3 %vm178_vm0, %v173_v9 }
  0x38   : > { %341 = vmatmul.msk.f32.gmra.mxu0 %vm178_vm0, %v167_v10  ;;  %343 = vmatmul.msk.f32.gmra.mxu1 %vm178_vm0, %v169_v11 }
  0xad   : > { %v220_v12 = vpop.f32.mrf.mxu0  ;;  %v226_v13 = vpop.f32.mrf.mxu1 }
  0xae   : > { %348 = vst.msk [vmem:[%s165_s4 + $0x2e] sm:$0xfc] %vm244_vm1, %v220_v12 }
  0xaf   : > { %350 = vst.msk [vmem:[%s165_s4 + $0x36] sm:$0x3] %vm251_vm2, %v220_v12 }
  0xb0   : > { %245 = vst.msk [vmem:[%s165_s4 - $0x2] sm:$0xfc] %vm244_vm1, %v226_v13 }
  0xb1   : > { %252 = vst.msk [vmem:[%s165_s4 + $0x6] sm:$0x3] %vm251_vm2, %v226_v13  ;;  %v232_v14 = vpop.f32.mrf.mxu2  ;;  %v238_v15 = vpop.f32.mrf.mxu3 }
  0xb2   : > { %247 = vst.msk [vmem:[%s165_s4 + $0xe] sm:$0xfc] %vm244_vm1, %v232_v14 }
  0xb3   : > { %254 = vst.msk [vmem:[%s165_s4 + $0x16] sm:$0x3] %vm251_vm2, %v232_v14 }
  0xb4   : > { %249 = vst.msk [vmem:[%s165_s4 + $0x1e] sm:$0xfc] %vm244_vm1, %v238_v15 }
  0xb5   : > { %256 = vst.msk [vmem:[%s165_s4 + $0x26] sm:$0x3] %vm251_vm2, %v238_v15  ;;  %v223_v16 = vpop.f32.mrf.mxu0  ;;  %v229_v17 = vpop.f32.mrf.mxu1 }
  0xb6   : > { %349 = vst.msk [vmem:[%s165_s4 + $0x36] sm:$0xfc] %vm244_vm1, %v223_v16 }
  0xb7   : > { %351 = vst.msk [vmem:[%s165_s4 + $0x3e] sm:$0x3] %vm251_vm2, %v223_v16 }
  0xb8   : > { %246 = vst.msk [vmem:[%s165_s4 + $0x6] sm:$0xfc] %vm244_vm1, %v229_v17 }
  0xb9   : > { %253 = vst.msk [vmem:[%s165_s4 + $0xe] sm:$0x3] %vm251_vm2, %v229_v17  ;;  %v235_v18 = vpop.f32.mrf.mxu2  ;;  %v241_v19 = vpop.f32.mrf.mxu3 }
  0xba   : > { %248 = vst.msk [vmem:[%s165_s4 + $0x16] sm:$0xfc] %vm244_vm1, %v235_v18 }
  0xbb   : > { %255 = vst.msk [vmem:[%s165_s4 + $0x1e] sm:$0x3] %vm251_vm2, %v235_v18 }
  0xbc   : > { %250 = vst.msk [vmem:[%s165_s4 + $0x26] sm:$0xfc] %vm244_vm1, %v241_v19 }
  0xbd   : > { %257 = vst.msk [vmem:[%s165_s4 + $0x2e] sm:$0x3] %vm251_vm2, %v241_v19 }
  0xbe PF: > { %p12_p7 = scmp.ge.s32.totalorder %s514_s14, 4   ;;  %s636_s9 = smov %s465_s10 }
  0xbf   : > { %s637_s10 = smov %s469_s11  ;;  %s638_s11 = smov %s524_s17 }
  0xc0   : > { %s639_s12 = smov %s514_s14  ;;  %14 = sbr.rel (!%p12_p7) target bundleno = 3 (0x3), region = 69 }
  0xc5   :  { %284 = vsyncpa [#allocation3], 1 }
  0xc6   :  { %286 = vsyncpa [#allocation3 + $0x1], 1 }

// kernel: w_msa_forward.5
= control target key start
LH: loop header
LB: loop body
LE: loop exit
PB: predicated region body
PF: predicated region fallthrough
CT: control target
= control target key end

     0   :  { %8 = vsyncpa [#allocation3], 0  ;;  %s669_s0 = inlined_call_operand.vmem [shape: f32[2,8,8,32], index: 0, kind: input, shape index: {}]   ;;  %s670_s1 = inlined_call_operand.vmem [shape: f32[32,32], index: 1, kind: input, shape index: {}]   ;;  %s671_s2 = inlined_call_operand.vmem [shape: f32[1,32], index: 2, kind: input, shape index: {}]   ;;  %s672_s3 = inlined_call_operand.hbm [shape: f32[2,8,8,32], index: 3, kind: output, shape index: {}]  }
   0x1   :  { %10 = vsyncpa [#allocation3 + $0x1], 0  ;;  %s522_s12 = smov 0   ;;  %s524_s13 = smov 0  }
   0x2   :  { %s526_s14 = smov 0   ;;  %s528_s15 = smov 0  }
   0x3 LB: > { %s543_s16 = sadd.s32 4294967295, %s498_s15   ;;  %s348_s17 = sadd.s32 4294967294, %s498_s15   ;;  %s498_s15 = sphi %s528_s15, %s678_s15   ;;  %s494_s14 = sphi %s526_s14, %s677_s14   ;;  %s490_s13 = sphi %s524_s13, %s676_s13   ;;  %s486_s12 = sphi %s522_s12, %s675_s12  }
   0x4   : > { %s547_s18 = sadd.s32 1, %s498_s15   ;;  %s91_s19 = sadd.s32 1, %s494_s14 }
   0x5   : > { %s88_s20 = ssub.s32 %s498_s15, %s547_s18  ;;  %p101_p0 = scmp.ne.s32.totalorder %s494_s14, %s490_s13 }
   0x6   : > { %p89_p1 = scmp.eq.s32.totalorder %s88_s20, 0  ;;  %p102_p2 = scmp.eq.s32.totalorder %s543_s16, 1 }
   0x7   : > { %p107_p3 = scmp.ne.s32.totalorder %s490_s13, %s486_s12  ;;  %p108_p4 = scmp.eq.s32.totalorder %s348_s17, 1 }
   0x8   : > { %s558_s21 = scalar_select %p89_p1, %s494_s14, %s91_s19  }
   0x9   : > { %p560_p5 = por %p102_p2, %p101_p0  ;;  %p564_p6 = por %p108_p4, %p107_p3 }
   0xa   : > { %p351_p7 = scmp.ge.s32.totalorder %s498_s15, 1  ;;  %p140_p8 = scmp.lt.s32.totalorder %s498_s15, 3 }
   0xc   : > { %p141_p9 = pnand %p351_p7, %p140_p8 }
   0xd   : > { %p164_p10 = scmp.lt.s32.totalorder (!%p141_p9), %s543_s16, 1  ;;  %s161_s10 = sand.u32 (!%p141_p9), 1, %s490_s13  }
   0xe   : > { %144 = sbr.rel (%p141_p9) target bundleno = 176 (0xb0), region = 32  ;;  %s352_s11 = sshll.u32 (!%p141_p9), %s161_s10, 6 }
   0xf   : > { %s601_s20 = scalar_lea.vmem (!%p141_p9), [#allocation2], %s352_s11  ;;  %s381_s24 = sshll.u32 (!%p141_p9), %s543_s16, 6 }
  0x10   : > { %s282_s27 = scalar_lea.hbm (!%p141_p9), %s672_s3, %s381_s24  ;;  %s271_s29 = scalar_lea.sflag (!%p141_p9), [#allocation3], %s161_s10 }
  0x11   : > { %s285_s28 = sshll.u32 (!%p141_p9), %s282_s27, 4  ;;  %s456_s7 = scalar_lea.hbm (!%p141_p9), %s672_s3, 128  ;;  %s286_s28 = int_to_ptr.hbm [resolvable:$true] %s285_s28 }
  0x13   : > { %v180_v0 = vld [vmem:[%s670_s1 + $0x18] sm:$0xff]  ;;  %v179_v1 = vld [vmem:[%s670_s1 + $0x10] sm:$0xff]  ;;  %v178_v2 = vld [vmem:[%s670_s1 + $0x8] sm:$0xff]  ;;  %s165_s30 = scalar_select %p164_p10, %s543_s16, 1  ;;  %vm185_vm0 = vcmask 261120   ;;  %vm252_vm1 = vcmask 259072  }
  0x14   : > { %383 = vmatpush.msra.mxu2 %v180_v0  ;;  %384 = vmatpush.msra.mxu3 %v180_v0  ;;  %v177_v3 = vld [vmem:[%s670_s1] sm:$0xff]  ;;  %vm259_vm2 = vcmask 261126   ;;  %s283_s16 = sshll.u32 %s601_s20, 4  ;;  %s284_s16 = int_to_ptr.vmem [resolvable:$true] %s283_s16 }
  0x15   : > { %222 = vmatpush.msra.mxu0 %v180_v0  ;;  %382 = vmatpush.msra.mxu1 %v180_v0  ;;  %s380_s6 = sshll.u32 %s165_s30, 6  ;;  %v435_v12 = vld [vmem:[%s671_s2] ss:$0 sm:$0xff]  ;;  %s450_s30 = sshra.s32 %s286_s28, 4  ;;  %s451_s30 = int_to_ptr.hbm [resolvable:$true] %s450_s30 }
  0x16   : > { %386 = vmatpush.msra.mxu2 %v179_v1  ;;  %387 = vmatpush.msra.mxu3 %v179_v1  ;;  %s168_s9 = scalar_lea.vmem %s669_s0, %s380_s6  ;;  %s452_s4 = scalar_lea.hbm %s451_s30, 64 }
  0x17   : > { %223 = vmatpush.msra.mxu0 %v179_v1  ;;  %385 = vmatpush.msra.mxu1 %v179_v1  ;;  %v173_v4 = vld [vmem:[%s168_s9 + $0x20] sm:$0xff]  ;;  %v175_v5 = vld [vmem:[%s168_s9 + $0x30] sm:$0xff]  ;;  %v174_v8 = vld [vmem:[%s168_s9 + $0x28] sm:$0xff]  ;;  %p453_p11 = scmp.ne.s32.totalorder %s451_s30, %s452_s4  ;;  %p457_p0 = scmp.lt.s32.totalorder %s451_s30, %s672_s3 }
  0x18   : > { %389 = vmatpush.msra.mxu2 %v178_v2  ;;  %390 = vmatpush.msra.mxu3 %v178_v2  ;;  %v169_v6 = vld [vmem:[%s168_s9] sm:$0xff]  ;;  %v171_v7 = vld [vmem:[%s168_s9 + $0x10] sm:$0xff]  ;;  %v176_v9 = vld [vmem:[%s168_s9 + $0x38] sm:$0xff]  ;;  %p458_p1 = scmp.lt.s32.totalorder %s456_s7, %s452_s4 }
  0x19   : > { %224 = vmatpush.msra.mxu0 %v178_v2  ;;  %388 = vmatpush.msra.mxu1 %v178_v2  ;;  %v170_v10 = vld [vmem:[%s168_s9 + $0x8] sm:$0xff]  ;;  %v172_v11 = vld [vmem:[%s168_s9 + $0x18] sm:$0xff]  ;;  %p454_p12 = pnand %p453_p11, %p560_p5 }
  0x1a   : > { %392 = vmatpush.msra.mxu2 %v177_v3  ;;  %393 = vmatpush.msra.mxu3 %v177_v3  ;;  %p459_p2 = por %p458_p1, %p457_p0 }
  0x1b   : > { %359 = vmatmul.msk.f32.vlgmr.msra.gmra.mxu2 %vm185_vm0, %v173_v4  ;;  %361 = vmatmul.msk.f32.vlgmr.msra.gmra.mxu3 %vm185_vm0, %v175_v5  ;;  %p455_p13 = pneg %p454_p12 }
  0x1c   : > { %225 = vmatpush.msra.mxu0 %v177_v3  ;;  %391 = vmatpush.msra.mxu1 %v177_v3 }
  0x1d   : > { %355 = vmatmul.msk.f32.vlgmr.msra.gmra.mxu0 %vm185_vm0, %v169_v6  ;;  %357 = vmatmul.msk.f32.vlgmr.msra.gmra.mxu1 %vm185_vm0, %v171_v7  ;;  %p460_p3 = pnand %p459_p2, %p455_p13 }
  0x23   : > { %360 = vmatmul.msk.f32.gmra.mxu2 %vm185_vm0, %v174_v8  ;;  %362 = vmatmul.msk.f32.gmra.mxu3 %vm185_vm0, %v176_v9 }
  0x25   : > { %356 = vmatmul.msk.f32.gmra.mxu0 %vm185_vm0, %v170_v10  ;;  %358 = vmatmul.msk.f32.gmra.mxu1 %vm185_vm0, %v172_v11 }
  0x9a   : > { %v227_v13 = vpop.f32.mrf.mxu0  ;;  %v233_v14 = vpop.f32.mrf.mxu1 }
  0x9b   : > { %v228_v15 = vadd.f32 %v435_v12, %v227_v13  ;;  %v234_v16 = vadd.f32 %v435_v12, %v233_v14 }
  0x9d   : > { %363 = vst.msk [vmem:[%s601_s20 + $0x12] sm:$0x3f] %vm252_vm1, %v228_v15 }
  0x9e   : > { %369 = vst.msk [vmem:[%s601_s20 + $0xa] sm:$0xc0] %vm259_vm2, %v228_v15  ;;  %v239_v17 = vpop.f32.mrf.mxu2  ;;  %v245_v18 = vpop.f32.mrf.mxu3 }
  0x9f   : > { %365 = vst.msk [vmem:[%s601_s20 + $0x22] sm:$0x3f] %vm252_vm1, %v234_v16  ;;  %v240_v19 = vadd.f32 %v435_v12, %v239_v17  ;;  %v246_v20 = vadd.f32 %v435_v12, %v245_v18 }
  0xa0   : > { %371 = vst.msk [vmem:[%s601_s20 + $0x1a] sm:$0xc0] %vm259_vm2, %v234_v16 }
  0xa1   : > { %367 = vst.msk [vmem:[%s601_s20 + $0x32] sm:$0x3f] %vm252_vm1, %v240_v19 }
  0xa2   : > { %373 = vst.msk [vmem:[%s601_s20 + $0x2a] sm:$0xc0] %vm259_vm2, %v240_v19  ;;  %v230_v21 = vpop.f32.mrf.mxu0  ;;  %v236_v22 = vpop.f32.mrf.mxu1 }
  0xa3   : > { %266 = vst.msk [vmem:[%s601_s20 + $0x2] sm:$0x3f] %vm252_vm1, %v246_v20  ;;  %v231_v23 = vadd.f32 %v435_v12, %v230_v21  ;;  %v237_v24 = vadd.f32 %v435_v12, %v236_v22 }
  0xa4   : > { %268 = vst.msk [vmem:[%s601_s20 - $0x6] sm:$0xc0] %vm259_vm2, %v246_v20 }
  0xa5   : > { %364 = vst.msk [vmem:[%s601_s20 + $0x1a] sm:$0x3f] %vm252_vm1, %v231_v23 }
  0xa6   : > { %370 = vst.msk [vmem:[%s601_s20 + $0x12] sm:$0xc0] %vm259_vm2, %v231_v23  ;;  %v242_v25 = vpop.f32.mrf.mxu2  ;;  %v248_v26 = vpop.f32.mrf.mxu3 }
  0xa7   : > { %366 = vst.msk [vmem:[%s601_s20 + $0x2a] sm:$0x3f] %vm252_vm1, %v237_v24  ;;  %v243_v27 = vadd.f32 %v435_v12, %v242_v25  ;;  %v249_v28 = vadd.f32 %v435_v12, %v248_v26 }
  0xa8   : > { %372 = vst.msk [vmem:[%s601_s20 + $0x22] sm:$0xc0] %vm259_vm2, %v237_v24 }
  0xa9   : > { %368 = vst.msk [vmem:[%s601_s20 + $0x3a] sm:$0x3f] %vm252_vm1, %v243_v27 }
  0xaa   : > { %374 = vst.msk [vmem:[%s601_s20 + $0x32] sm:$0xc0] %vm259_vm2, %v243_v27 }
  0xab   : > { %267 = vst.msk [vmem:[%s601_s20 + $0xa] sm:$0x3f] %vm252_vm1, %v249_v28 }
  0xac   : > { %269 = vst.msk [vmem:[%s601_s20 + $0x2] sm:$0xc0] %vm259_vm2, %v249_v28 }
  0xad   : > { %463 = shalt.err (!%p460_p3)
}
  0xae   : > { %s500_s10 = smov 128   ;;  %s501_s11 = smov 8  }
  0xaf   : > { %394 = dma.vmem_to_hbm [thread:$0]  (%p560_p5), %s284_s16, 1024, %s286_s28, %s271_s29, %s500_s10, %s500_s10, %s501_s11  }
  0xb0 PF: > { %p400_p4 = scmp.ge.s32.totalorder %s498_s15, 2  ;;  %s300_s17 = sand.u32 1, %s486_s12  }
  0xb1   : > { %s301_s19 = scalar_lea.sflag [#allocation3], %s300_s17 }
  0xb2   : > { %p397_p7 = pnand %p400_p4, %p564_p6 }
  0xb4   : > { %p398_p8 = pneg %p397_p7 }
  0xb6   : > { %481 = dma.done.wait (%p398_p8), %s301_s19, 1024  }
  0xb7   : > { %483 = vsyncadd (%p398_p8), %s301_s19, 4294966272  ;;  %p13_p9 = scmp.ge.s32.totalorder %s547_s18, 4   ;;  %s675_s12 = smov %s490_s13 }
  0xb8   : > { %s676_s13 = smov %s494_s14  ;;  %s677_s14 = smov %s558_s21 }
  0xb9   : > { %s678_s15 = smov %s547_s18  ;;  %15 = sbr.rel (!%p13_p9) target bundleno = 3 (0x3), region = 68 }
  0xbe   :  { %307 = vsyncpa [#allocation3], 1 }
  0xbf   :  { %309 = vsyncpa [#allocation3 + $0x1], 1 }

// kernel: w_msa_forward.4
= control target key start
LH: loop header
LB: loop body
LE: loop exit
PB: predicated region body
PF: predicated region fallthrough
CT: control target
= control target key end

     0   :  { %s2332_s9 = smov 0   ;;  %s3067_s0 = inlined_call_operand.vmem [shape: f32[2,4,16,96], index: 0, kind: input, shape index: {}]   ;;  %s3068_s1 = inlined_call_operand.vmem [shape: f32[4,16,16], index: 1, kind: input, shape index: {}]   ;;  %s3069_s2 = inlined_call_operand.vmem [shape: f32[2,4,16,32], index: 2, kind: output, shape index: {}]  }
   0x1 LB: > { %s1940_s10 = sadd.s32 4294967295, %s2301_s9   ;;  %p1944_p0 = scmp.ge.s32.totalorder %s2301_s9, 1  ;;  %s2301_s9 = sphi %s2332_s9, %s12_s9  }
   0x2   : > { %p112_p1 = scmp.lt.s32.totalorder %s2301_s9, 3 }
   0x4   : > { %p113_p2 = pnand %p1944_p0, %p112_p1 }
   0x5   : > { %p134_p3 = scmp.lt.s32.totalorder (!%p113_p2), %s1940_s10, 1  ;;  %s2303_s15 = smov (!%p113_p2), 96  }
   0x6   : > { %116 = sbr.rel (%p113_p2) target bundleno = 2185 (0x889), region = 28  ;;  %s2304_s16 = smov (!%p113_p2), 88  }
   0x7   : > { %s2305_s17 = smov (!%p113_p2), 120   ;;  %s2306_s18 = smov (!%p113_p2), 64  }
   0x8   : > { %s2307_s7 = smov (!%p113_p2), 80   ;;  %s2308_s8 = smov (!%p113_p2), 112  }
   0x9   : > { %s2309_s12 = smov (!%p113_p2), 56   ;;  %s2313_s6 = smov (!%p113_p2), 40  }
   0xb   : > { %s3071_s10 = smov (!%p134_p3, %s1940_s10), 1  ;;  %vm166_vm0 = vcmask 64512   ;;  %v2450_v32 = vld [vmem:[%s3068_s1 + $0x10] sm:$0xff]  ;;  %v2455_v33 = vld [vmem:[%s3068_s1] sm:$0xff]  ;;  %vm325_vm1 = vcmask 130048   ;;  %v2486_v50 = vld [vmem:[%s3068_s1 + $0x8] sm:$0xff] }
   0xc   : > { %s2047_s11 = sshll.u32 %s3071_s10, 6  ;;  %v2466_v42 = vld [vmem:[%s3068_s1 + $0x30] sm:$0xff]  ;;  %v2471_v43 = vld [vmem:[%s3068_s1 + $0x20] sm:$0xff]  ;;  %v2495_v59 = vld [vmem:[%s3068_s1 + $0x18] sm:$0xff]  ;;  %s2310_s10 = smov 72   ;;  %vm994_vm2 = vcmask 130112  }
   0xd   : > { %s2348_s14 = scalar_lea.vmem %s3067_s0, %s2047_s11  ;;  %v2501_v61 = vld [vmem:[%s3068_s1 + $0x28] sm:$0xff]  ;;  %vm1435_vm3 = vcmask 195712   ;;  %vm1876_vm4 = vcmask 261312  }
   0xe   : > { %v2351_v0 = vld [vmem:[%s2348_s14 + $0x28] sm:$0xff]  ;;  %v2354_v1 = vld [vmem:[%s2348_s14 + $0x20] sm:$0xff]  ;;  %v2363_v3 = vld [vmem:[%s2348_s14 + $0x38] sm:$0xff] }
   0xf   : > { %239 = vrot.lane.b32.xlu0 %v2351_v0, %s2303_s15  ;;  %237 = vrot.lane.b32.xlu1 %v2354_v1, %s2303_s15  ;;  %v2359_v2 = vld [vmem:[%s2348_s14 + $0x8] sm:$0xff]  ;;  %v2366_v4 = vld [vmem:[%s2348_s14 + $0x30] sm:$0xff]  ;;  %v2394_v11 = vpack.i.bf16 %v2363_v3, %v2351_v0 }
  0x10   : > { %164 = vrot.lane.b32.xlu2 %v2359_v2, %s2303_s15  ;;  %v2369_v5 = vld [vmem:[%s2348_s14 + $0x18] sm:$0xff]  ;;  %v2375_v6 = vld [vmem:[%s2348_s14 + $0x10] sm:$0xff]  ;;  %v2378_v7 = vld [vmem:[%s2348_s14] sm:$0xff]  ;;  %v2390_v10 = vpack.i.bf16 %v2366_v4, %v2354_v1 }
  0x11   : > { %v2411_v16 = vpack.i.bf16 %v2375_v6, %v2378_v7  ;;  %v2442_v19 = vpack.i.bf16 %v2369_v5, %v2359_v2 }
  0x17   : > { %276 = vrot.lane.b32.xlu0 %v2363_v3, %s2303_s15  ;;  %274 = vrot.lane.b32.xlu1 %v2366_v4, %s2303_s15 }
  0x18   : > { %202 = vrot.lane.b32.xlu2 %v2369_v5, %s2303_s15 }
  0x1f   : > { %200 = vrot.lane.b32.xlu1 %v2375_v6, %s2303_s15  ;;  %162 = vrot.lane.b32.xlu0 %v2378_v7, %s2303_s15 }
  0x20   : > { %2072 = vrot.lane.b32.xlu2 %v2394_v11, %s2306_s18 }
  0x27   : > { %646 = vrot.lane.b32.xlu1 %v2351_v0, %s2304_s16  ;;  %2077 = vrot.lane.b32.xlu0 %v2390_v10, %s2306_s18 }
  0x28   : > { %685 = vrot.lane.b32.xlu2 %v2363_v3, %s2304_s16 }
  0x2f   : > { %642 = vrot.lane.b32.xlu1 %v2351_v0, %s2305_s17  ;;  %644 = vrot.lane.b32.xlu0 %v2354_v1, %s2304_s16 }
  0x30   : > { %683 = vrot.lane.b32.xlu2 %v2366_v4, %s2304_s16 }
  0x37   : > { %2087 = vrot.lane.b32.xlu0 %v2411_v16, %s2306_s18 }
  0x38   : > { %640 = vrot.lane.b32.xlu2 %v2354_v1, %s2305_s17 }
  0x3f   : > { %681 = vrot.lane.b32.xlu0 %v2363_v3, %s2305_s17 }
  0x40   : > { %679 = vrot.lane.b32.xlu2 %v2366_v4, %s2305_s17 }
  0x48   : > { %2082 = vrot.lane.b32.xlu2 %v2442_v19, %s2306_s18 }
  0x6a   : > { %v165_v8 = vpop.permute.xlu2 %164 }
  0x6b   : > { %1949 = vmatpush.xpose.msk.msra.mxu0 %vm166_vm0, %v165_v8 }
  0x72   : > { %v203_v9 = vpop.permute.xlu2 %202 }
  0x73   : > { %1953 = vmatpush.xpose.msk.msra.mxu1 %vm166_vm0, %v203_v9 }
  0x7a   : > { %v2073_v20 = vpop.permute.xlu2 %2072 }
  0x7b   : > { %v2074_v21 = vunpack.i.l.bf16 %v2073_v20  ;;  %v2075_v22 = vunpack.i.h.bf16 %v2073_v20 }
  0x81   : > { %v240_v12 = vpop.permute.xlu0 %239  ;;  %v238_v13 = vpop.permute.xlu1 %237 }
  0x82   : > { %1957 = vmatpush.xpose.msk.msra.mxu2 %vm166_vm0, %v240_v12  ;;  %v686_v25 = vpop.permute.xlu2 %685 }
  0x86   : > { %1958 = vmatpush.xpose.msk.msra.mxu2 %vm166_vm0, %v238_v13 }
  0x89   : > { %v277_v14 = vpop.permute.xlu0 %276  ;;  %v275_v15 = vpop.permute.xlu1 %274  ;;  %1959 = vmatmul.msk.f32.vlgmr.msra.gmra.mxu2 %vm166_vm0, %v2354_v1 }
  0x8a   : > { %1961 = vmatpush.xpose.msk.msra.mxu3 %vm166_vm0, %v277_v14  ;;  %510 = vmatpush.msrb.mxu2 %v2074_v21  ;;  %v684_v29 = vpop.permute.xlu2 %683 }
  0x8e   : > { %1962 = vmatpush.xpose.msk.msra.mxu3 %vm166_vm0, %v275_v15  ;;  %v2512_v15 = vld [vmem:[%s3068_s1 + $0x38] sm:$0xff] }
  0x91   : > { %v201_v17 = vpop.permute.xlu1 %200  ;;  %v163_v18 = vpop.permute.xlu0 %162  ;;  %1963 = vmatmul.msk.f32.vlgmr.msra.gmra.mxu3 %vm166_vm0, %v2366_v4  ;;  %1960 = vmatmul.msk.f32.gmra.mxu2 %vm166_vm0, %v2351_v0 }
  0x92   : > { %1950 = vmatpush.xpose.msk.msra.mxu0 %vm166_vm0, %v163_v18  ;;  %1954 = vmatpush.xpose.msk.msra.mxu1 %vm166_vm0, %v201_v17  ;;  %v2481_v48 = vpop.permute.xlu2 %640 }
  0x93   : > { %545 = vmatpush.msrb.mxu3 %v2075_v22 }
  0x95   : > { %1951 = vmatmul.msk.f32.vlgmr.msra.gmra.mxu0 %vm166_vm0, %v2378_v7  ;;  %1955 = vmatmul.msk.f32.vlgmr.msra.gmra.mxu1 %vm166_vm0, %v2375_v6 }
  0x99   : > { %1964 = vmatmul.msk.f32.gmra.mxu3 %vm166_vm0, %v2363_v3  ;;  %v2078_v23 = vpop.permute.xlu0 %2077  ;;  %v647_v27 = vpop.permute.xlu1 %646 }
  0x9a   : > { %v2080_v24 = vunpack.i.h.bf16 %v2078_v23  ;;  %v2079_v26 = vunpack.i.l.bf16 %v2078_v23  ;;  %v2504_v63 = vpop.permute.xlu2 %679 }
  0x9c   : > { %546 = vmatpush.msrb.mxu3 %v2080_v24  ;;  %511 = vmatpush.msrb.mxu2 %v2079_v26 }
  0x9d   : > { %1952 = vmatmul.msk.f32.gmra.mxu0 %vm166_vm0, %v2359_v2  ;;  %1956 = vmatmul.msk.f32.gmra.mxu1 %vm166_vm0, %v2369_v5 }
  0x9e   : > { %1985 = vmatpush.xpose.msk.msra.mxu3 %vm166_vm0, %v686_v25  ;;  %1981 = vmatpush.xpose.msk.msra.mxu2 %vm166_vm0, %v647_v27 }
  0xa1   : > { %v645_v37 = vpop.permute.xlu0 %644 }
  0xa2   : > { %1986 = vmatpush.xpose.msk.msra.mxu3 %vm166_vm0, %v684_v29  ;;  %1982 = vmatpush.xpose.msk.msra.mxu2 %vm166_vm0, %v645_v37  ;;  %v2083_v20 = vpop.permute.xlu2 %2082  ;;  %v2529_v29 = vpop.permute.xlu1 %642 }
  0xa3   : > { %v2084_v21 = vunpack.i.l.bf16 %v2083_v20  ;;  %v2085_v22 = vunpack.i.h.bf16 %v2083_v20 }
  0xa5   : > { %440 = vmatpush.msrb.mxu0 %v2084_v21  ;;  %475 = vmatpush.msrb.mxu1 %v2085_v22 }
  0xa9   : > { %v2088_v17 = vpop.permute.xlu0 %2087 }
  0xaa   : > { %v2089_v23 = vunpack.i.l.bf16 %v2088_v17  ;;  %v2090_v24 = vunpack.i.h.bf16 %v2088_v17 }
  0xac   : > { %441 = vmatpush.msrb.mxu0 %v2089_v23  ;;  %476 = vmatpush.msrb.mxu1 %v2090_v24 }
  0xb1   : > { %v2527_v26 = vpop.permute.xlu0 %681 }
 0x10c   : > { %v266_v28 = vpop.f32.mrf.mxu2 }
 0x10d   : > { %v313_v40 = vmul.f32 0.35355338, %v266_v28 }
 0x10f   : > { %v321_v47 = vadd.f32 %v313_v40, %v2471_v43 }
 0x111   : > { %v338_v55 = vsel %vm325_vm1, %v321_v47, -inf }
 0x112   : > { %v192_v30 = vpop.f32.mrf.mxu0  ;;  %v229_v31 = vpop.f32.mrf.mxu1 }
 0x113   : > { %v309_v34 = vmul.f32 0.35355338, %v192_v30  ;;  %v311_v35 = vmul.f32 0.35355338, %v229_v31 }
 0x114   : > { %v303_v36 = vpop.f32.mrf.mxu3  ;;  %v269_v53 = vpop.f32.mrf.mxu2 }
 0x115   : > { %v2460_v38 = vadd.f32 %v311_v35, %v2450_v32  ;;  %v317_v39 = vadd.f32 %v309_v34, %v2455_v33  ;;  %v315_v41 = vmul.f32 0.35355338, %v303_v36  ;;  %v314_v58 = vmul.f32 0.35355338, %v269_v53 }
 0x117   : > { %v332_v44 = vsel %vm325_vm1, %v2460_v38, -inf  ;;  %v326_v45 = vsel %vm325_vm1, %v317_v39, -inf  ;;  %v2478_v46 = vadd.f32 %v315_v41, %v2466_v42  ;;  %v322_v8 = vadd.f32 %v314_v58, %v2501_v61 }
 0x118   : > { %333 = vmax.xlane.f32.xlu0 %v332_v44  ;;  %327 = vmax.xlane.f32.xlu2 %v326_v45 }
 0x119   : > { %v344_v54 = vsel %vm325_vm1, %v2478_v46, -inf  ;;  %v341_v14 = vsel %vm325_vm1, %v322_v8, -inf }
 0x11a   : > { %v195_v49 = vpop.f32.mrf.mxu0  ;;  %v232_v51 = vpop.f32.mrf.mxu1 }
 0x11b   : > { %v310_v52 = vmul.f32 0.35355338, %v195_v49  ;;  %v312_v57 = vmul.f32 0.35355338, %v232_v51 }
 0x11c   : > { %v306_v9 = vpop.f32.mrf.mxu3 }
 0x11d   : > { %v318_v56 = vadd.f32 %v310_v52, %v2486_v50  ;;  %v320_v62 = vadd.f32 %v312_v57, %v2495_v59  ;;  %v316_v13 = vmul.f32 0.35355338, %v306_v9 }
 0x11f   : > { %v329_v60 = vsel %vm325_vm1, %v318_v56, -inf  ;;  %v335_v12 = vsel %vm325_vm1, %v320_v62, -inf  ;;  %v2515_v18 = vadd.f32 %v316_v13, %v2512_v15 }
 0x120   : > { %345 = vmax.xlane.f32.xlu0 %v344_v54  ;;  %339 = vmax.xlane.f32.xlu2 %v338_v55 }
 0x121   : > { %330 = vmax.xlane.f32.xlu1 %v329_v60  ;;  %v347_v25 = vsel %vm325_vm1, %v2515_v18, -inf }
 0x128   : > { %336 = vmax.xlane.f32.xlu2 %v335_v12 }
 0x129   : > { %342 = vmax.xlane.f32.xlu1 %v341_v14 }
 0x130   : > { %348 = vmax.xlane.f32.xlu2 %v347_v25 }
 0x134   : > { %607 = vrot.lane.b32.xlu0 %v2369_v5, %s2304_s16 }
 0x13c   : > { %605 = vrot.lane.b32.xlu0 %v2375_v6, %s2304_s16 }
 0x142   : > { %566 = vrot.lane.b32.xlu1 %v2378_v7, %s2304_s16 }
 0x148   : > { %568 = vrot.lane.b32.xlu2 %v2359_v2, %s2304_s16  ;;  %s2611_s16 = scalar_lea.vmem %s3069_s2, %s2047_s11  ;;  %s2311_s11 = smov 48  }
 0x18b   : > { %v328_v27 = vpop.xlane.xlu2 %327  ;;  %v334_v28 = vpop.xlane.xlu0 %333 }
 0x18c   : > { %v350_v30 = vsub.f32 %v317_v39, %v328_v27  ;;  %v352_v31 = vsub.f32 %v2460_v38, %v334_v28 }
 0x18e   : > { %v358_v34 = vmul.f32 1.442695, %v350_v30  ;;  %v362_v35 = vmul.f32 1.442695, %v352_v31 }
 0x190   : > { %2151 = vpow2.f32 %v358_v34 }
 0x191   : > { %2153 = vpow2.f32 %v362_v35 }
 0x193   : > { %v340_v36 = vpop.xlane.xlu2 %339  ;;  %v346_v37 = vpop.xlane.xlu0 %345 }
 0x194   : > { %v354_v40 = vsub.f32 %v321_v47, %v340_v36  ;;  %v331_v41 = vpop.xlane.xlu1 %330  ;;  %v356_v44 = vsub.f32 %v2478_v46, %v346_v37 }
 0x195   : > { %v351_v45 = vsub.f32 %v318_v56, %v331_v41 }
 0x196   : > { %v2533_v49 = vpop.eup %2151  ;;  %v366_v51 = vmul.f32 1.442695, %v354_v40  ;;  %v370_v52 = vmul.f32 1.442695, %v356_v44 }
 0x197   : > { %v2535_v53 = vpop.eup %2153  ;;  %v360_v39 = vmul.f32 1.442695, %v351_v45  ;;  %v374_v38 = vsel %vm325_vm1, %v2533_v49, 0.0 }
 0x198   : > { %2155 = vpow2.f32 %v366_v51  ;;  %375 = vadd.xlane.f32.xlu1 %v374_v38  ;;  %v380_v54 = vsel %vm325_vm1, %v2535_v53, 0.0 }
 0x199   : > { %2157 = vpow2.f32 %v360_v39  ;;  %381 = vadd.xlane.f32.xlu0 %v380_v54 }
 0x19a   : > { %2159 = vpow2.f32 %v370_v52 }
 0x19b   : > { %v337_v46 = vpop.xlane.xlu2 %336 }
 0x19c   : > { %v353_v47 = vsub.f32 %v320_v62, %v337_v46  ;;  %v343_v55 = vpop.xlane.xlu1 %342 }
 0x19d   : > { %v355_v56 = vsub.f32 %v322_v8, %v343_v55 }
 0x19e   : > { %v2541_v57 = vpop.eup %2155  ;;  %v364_v58 = vmul.f32 1.442695, %v353_v47 }
 0x19f   : > { %v2158_v60 = vpop.eup %2157  ;;  %v368_v9 = vmul.f32 1.442695, %v355_v56  ;;  %v386_v12 = vsel %vm325_vm1, %v2541_v57, 0.0 }
 0x1a0   : > { %v2160_v13 = vpop.eup %2159  ;;  %2161 = vpow2.f32 %v364_v58  ;;  %v377_v14 = vsel %vm325_vm1, %v2158_v60, 0.0 }
 0x1a1   : > { %2163 = vpow2.f32 %v368_v9  ;;  %378 = vadd.xlane.f32.xlu2 %v377_v14  ;;  %387 = vadd.xlane.f32.xlu0 %v386_v12  ;;  %v392_v17 = vsel %vm325_vm1, %v2160_v13, 0.0 }
 0x1a2   : > { %393 = vadd.xlane.f32.xlu1 %v392_v17 }
 0x1a3   : > { %v349_v62 = vpop.xlane.xlu2 %348 }
 0x1a4   : > { %v357_v8 = vsub.f32 %v2515_v18, %v349_v62 }
 0x1a6   : > { %v2162_v20 = vpop.eup %2161  ;;  %v372_v21 = vmul.f32 1.442695, %v357_v8  ;;  %v608_v30 = vpop.permute.xlu0 %607 }
 0x1a7   : > { %v2164_v22 = vpop.eup %2163  ;;  %v383_v23 = vsel %vm325_vm1, %v2162_v20, 0.0  ;;  %1977 = vmatpush.xpose.msk.msra.mxu1 %vm166_vm0, %v608_v30 }
 0x1a8   : > { %2165 = vpow2.f32 %v372_v21  ;;  %v389_v24 = vsel %vm325_vm1, %v2164_v22, 0.0 }
 0x1a9   : > { %390 = vadd.xlane.f32.xlu0 %v389_v24 }
 0x1aa   : > { %384 = vadd.xlane.f32.xlu1 %v383_v23 }
 0x1ab   : > { %v569_v28 = vpop.permute.xlu2 %568 }
 0x1ac   : > { %1973 = vmatpush.xpose.msk.msra.mxu0 %vm166_vm0, %v569_v28 }
 0x1ae   : > { %v2166_v25 = vpop.eup %2165  ;;  %v606_v31 = vpop.permute.xlu0 %605 }
 0x1af   : > { %v395_v27 = vsel %vm325_vm1, %v2166_v25, 0.0  ;;  %1978 = vmatpush.xpose.msk.msra.mxu1 %vm166_vm0, %v606_v31 }
 0x1b2   : > { %396 = vadd.xlane.f32.xlu1 %v395_v27 }
 0x1b4   : > { %v567_v18 = vpop.permute.xlu1 %566 }
 0x1b5   : > { %1974 = vmatpush.xpose.msk.msra.mxu0 %vm166_vm0, %v567_v18 }
 0x1b9   : > { %603 = vrot.lane.b32.xlu2 %v2369_v5, %s2305_s17 }
 0x1bd   : > { %601 = vrot.lane.b32.xlu0 %v2375_v6, %s2305_s17 }
 0x1c1   : > { %2097 = vrot.lane.b32.xlu2 %v2390_v10, %s2309_s12 }
 0x1c5   : > { %1126 = vrot.lane.b32.xlu0 %v2363_v3, %s2307_s7 }
 0x1c9   : > { %1124 = vrot.lane.b32.xlu2 %v2366_v4, %s2307_s7 }
 0x1cb   : > { %562 = vrot.lane.b32.xlu1 %v2378_v7, %s2305_s17 }
 0x1cd   : > { %1081 = vrot.lane.b32.xlu0 %v2354_v1, %s2308_s8 }
 0x1d3   : > { %564 = vrot.lane.b32.xlu1 %v2359_v2, %s2305_s17  ;;  %s2312_s17 = smov 104  }
 0x1d5   : > { %1120 = vrot.lane.b32.xlu0 %v2366_v4, %s2308_s8 }
 0x1db   : > { %2092 = vrot.lane.b32.xlu1 %v2394_v11, %s2309_s12 }
 0x1dd   : > { %2107 = vrot.lane.b32.xlu0 %v2411_v16, %s2309_s12 }
 0x1e3   : > { %1087 = vrot.lane.b32.xlu1 %v2351_v0, %s2307_s7 }
 0x1e5   : > { %1083 = vrot.lane.b32.xlu0 %v2351_v0, %s2308_s8 }
 0x1eb   : > { %1085 = vrot.lane.b32.xlu1 %v2354_v1, %s2307_s7 }
 0x1ed   : > { %1122 = vrot.lane.b32.xlu0 %v2363_v3, %s2308_s8 }
 0x1f3   : > { %2102 = vrot.lane.b32.xlu1 %v2442_v19, %s2309_s12 }
 0x20b   : > { %v376_v34 = vpop.xlane.xlu1 %375 }
 0x20c   : > { %2167 = vrcp.f32 %v376_v34  ;;  %v382_v35 = vpop.xlane.xlu0 %381 }
 0x20d   : > { %2169 = vrcp.f32 %v382_v35 }
 0x212   : > { %v2168_v36 = vpop.eup %2167 }
 0x213   : > { %v2170_v37 = vpop.eup %2169  ;;  %v406_v40 = vmul.f32 %v2168_v36, %v2533_v49 }
 0x214   : > { %v379_v41 = vpop.xlane.xlu2 %378  ;;  %v388_v44 = vpop.xlane.xlu0 %387  ;;  %v408_v45 = vmul.f32 %v2170_v37, %v2535_v53 }
 0x215   : > { %2171 = vrcp.f32 %v379_v41  ;;  %v394_v51 = vpop.xlane.xlu1 %393  ;;  %1965 = vmatmul.msk.f32.vlgmr.msrb.gmra.mxu0 %vm325_vm1, %v406_v40 }
 0x216   : > { %2173 = vrcp.f32 %v394_v51  ;;  %1967 = vmatmul.msk.f32.vlgmr.msrb.gmra.mxu1 %vm325_vm1, %v408_v45 }
 0x217   : > { %2175 = vrcp.f32 %v388_v44 }
 0x21b   : > { %v2172_v52 = vpop.eup %2171 }
 0x21c   : > { %v2174_v39 = vpop.eup %2173  ;;  %v391_v38 = vpop.xlane.xlu0 %390  ;;  %v407_v54 = vmul.f32 %v2172_v52, %v2158_v60 }
 0x21d   : > { %v2176_v46 = vpop.eup %2175  ;;  %v385_v47 = vpop.xlane.xlu1 %384  ;;  %2177 = vrcp.f32 %v391_v38  ;;  %v412_v49 = vmul.f32 %v2174_v39, %v2160_v13 }
 0x21e   : > { %2179 = vrcp.f32 %v385_v47  ;;  %1966 = vmatmul.msk.f32.gmra.mxu0 %vm325_vm1, %v407_v54  ;;  %v410_v53 = vmul.f32 %v2176_v46, %v2541_v57  ;;  %v604_v14 = vpop.permute.xlu2 %603 }
 0x21f   : > { %1971 = vmatmul.msk.f32.vlgmr.msrb.gmra.mxu3 %vm325_vm1, %v412_v49 }
 0x220   : > { %1969 = vmatmul.msk.f32.vlgmr.msrb.gmra.mxu2 %vm325_vm1, %v410_v53 }
 0x223   : > { %v2178_v55 = vpop.eup %2177 }
 0x224   : > { %v2180_v56 = vpop.eup %2179  ;;  %v411_v58 = vmul.f32 %v2178_v55, %v2164_v22 }
 0x225   : > { %v397_v9 = vpop.xlane.xlu1 %396  ;;  %v409_v12 = vmul.f32 %v2180_v56, %v2162_v20 }
 0x226   : > { %2181 = vrcp.f32 %v397_v9  ;;  %v2098_v47 = vpop.permute.xlu2 %2097 }
 0x227   : > { %1968 = vmatmul.msk.f32.gmra.mxu1 %vm325_vm1, %v409_v12  ;;  %v2100_v56 = vunpack.i.h.bf16 %v2098_v47 }
 0x228   : > { %1970 = vmatmul.msk.f32.gmra.mxu2 %vm325_vm1, %v411_v58  ;;  %v2099_v58 = vunpack.i.l.bf16 %v2098_v47 }
 0x22c   : > { %v2182_v57 = vpop.eup %2181 }
 0x22d   : > { %v413_v60 = vmul.f32 %v2182_v57, %v2166_v25 }
 0x22f   : > { %1972 = vmatmul.msk.f32.gmra.mxu3 %vm325_vm1, %v413_v60  ;;  %v602_v13 = vpop.permute.xlu0 %601 }
 0x230   : > { %1983 = vmatmul.msk.f32.vlgmr.msra.gmra.mxu2 %vm166_vm0, %v2481_v48  ;;  %1979 = vmatmul.msk.f32.vlgmr.msra.gmra.mxu1 %vm166_vm0, %v602_v13 }
 0x237   : > { %1987 = vmatmul.msk.f32.vlgmr.msra.gmra.mxu3 %vm166_vm0, %v2504_v63  ;;  %v1127_v49 = vpop.permute.xlu0 %1126 }
 0x238   : > { %1984 = vmatmul.msk.f32.gmra.mxu2 %vm166_vm0, %v2529_v29  ;;  %1980 = vmatmul.msk.f32.gmra.mxu1 %vm166_vm0, %v604_v14 }
 0x23d   : > { %v563_v48 = vpop.permute.xlu1 %562 }
 0x23e   : > { %1975 = vmatmul.msk.f32.vlgmr.msra.gmra.mxu0 %vm166_vm0, %v563_v48 }
 0x23f   : > { %1988 = vmatmul.msk.f32.gmra.mxu3 %vm166_vm0, %v2527_v26  ;;  %v2654_v48 = vpop.permute.xlu0 %1081 }
 0x245   : > { %v565_v63 = vpop.permute.xlu1 %564 }
 0x246   : > { %1976 = vmatmul.msk.f32.gmra.mxu0 %vm166_vm0, %v565_v63 }
 0x24d   : > { %v2093_v25 = vpop.permute.xlu1 %2092 }
 0x24e   : > { %v2095_v30 = vunpack.i.h.bf16 %v2093_v25  ;;  %v2094_v18 = vunpack.i.l.bf16 %v2093_v25  ;;  %v1125_v25 = vpop.permute.xlu2 %1124 }
 0x250   : > { %953 = vmatpush.msrb.mxu3 %v2095_v30  ;;  %918 = vmatpush.msrb.mxu2 %v2094_v18 }
 0x252   : > { %954 = vmatpush.msrb.mxu3 %v2100_v56  ;;  %919 = vmatpush.msrb.mxu2 %v2099_v58 }
 0x254   : > { %2009 = vmatpush.xpose.msk.msra.mxu3 %vm166_vm0, %v1127_v49 }
 0x255   : > { %v1088_v9 = vpop.permute.xlu1 %1087 }
 0x256   : > { %2005 = vmatpush.xpose.msk.msra.mxu2 %vm166_vm0, %v1088_v9 }
 0x258   : > { %2010 = vmatpush.xpose.msk.msra.mxu3 %vm166_vm0, %v1125_v25 }
 0x25d   : > { %v1086_v63 = vpop.permute.xlu1 %1085 }
 0x25e   : > { %2006 = vmatpush.xpose.msk.msra.mxu2 %vm166_vm0, %v1086_v63 }
 0x292   : > { %v443_v29 = vpop.f32.mrf.mxu0 }
 0x293   : > { %554 = vst.msk [vmem:[%s2611_s16] sm:$0xff] %vm166_vm0, %v443_v29  ;;  %v478_v26 = vpop.f32.mrf.mxu1 }
 0x294   : > { %556 = vst.msk [vmem:[%s2611_s16 + $0x10] sm:$0xff] %vm166_vm0, %v478_v26 }
 0x29b   : > { %v446_v17 = vpop.f32.mrf.mxu0 }
 0x29c   : > { %555 = vst.msk [vmem:[%s2611_s16 + $0x8] sm:$0xff] %vm166_vm0, %v446_v17  ;;  %v2660_v17 = vpop.permute.xlu0 %1120 }
 0x2a2   : > { %v548_v62 = vpop.f32.mrf.mxu3 }
 0x2a3   : > { %v513_v8 = vpop.f32.mrf.mxu2  ;;  %560 = vst.msk [vmem:[%s2611_s16 + $0x30] sm:$0xff] %vm166_vm0, %v548_v62  ;;  %v2103_v62 = vpop.permute.xlu1 %2102 }
 0x2a4   : > { %558 = vst.msk [vmem:[%s2611_s16 + $0x20] sm:$0xff] %vm166_vm0, %v513_v8  ;;  %v481_v20 = vpop.f32.mrf.mxu1  ;;  %v2105_v8 = vunpack.i.h.bf16 %v2103_v62 }
 0x2a5   : > { %557 = vst.msk [vmem:[%s2611_s16 + $0x18] sm:$0xff] %vm166_vm0, %v481_v20  ;;  %v2104_v20 = vunpack.i.l.bf16 %v2103_v62 }
 0x2a6   : > { %883 = vmatpush.msrb.mxu1 %v2105_v8 }
 0x2a7   : > { %848 = vmatpush.msrb.mxu0 %v2104_v20 }
 0x2ab   : > { %v516_v21 = vpop.f32.mrf.mxu2 }
 0x2ac   : > { %559 = vst.msk [vmem:[%s2611_s16 + $0x28] sm:$0xff] %vm166_vm0, %v516_v21  ;;  %v2108_v21 = vpop.permute.xlu0 %2107 }
 0x2ad   : > { %v634_v22 = vpop.f32.mrf.mxu1 }
 0x2ae   : > { %v720_v23 = vmul.f32 0.35355338, %v634_v22  ;;  %v2110_v22 = vunpack.i.h.bf16 %v2108_v21 }
 0x2b0   : > { %v2628_v24 = vadd.f32 %v720_v23, %v2450_v32  ;;  %v2109_v23 = vunpack.i.l.bf16 %v2108_v21  ;;  %884 = vmatpush.msrb.mxu1 %v2110_v22 }
 0x2b2   : > { %v551_v27 = vpop.f32.mrf.mxu3  ;;  %v740_v28 = vsel %vm325_vm1, %v2628_v24, -inf  ;;  %849 = vmatpush.msrb.mxu0 %v2109_v23 }
 0x2b3   : > { %561 = vst.msk [vmem:[%s2611_s16 + $0x38] sm:$0xff] %vm166_vm0, %v551_v27  ;;  %v673_v31 = vpop.f32.mrf.mxu2  ;;  %741 = vmax.xlane.f32.xlu2 %v740_v28 }
 0x2b4   : > { %v722_v12 = vmul.f32 0.35355338, %v673_v31  ;;  %v2673_v31 = vpop.permute.xlu0 %1083 }
 0x2b5   : > { %v637_v34 = vpop.f32.mrf.mxu1 }
 0x2b6   : > { %v721_v45 = vmul.f32 0.35355338, %v637_v34  ;;  %v730_v14 = vadd.f32 %v722_v12, %v2471_v43 }
 0x2b8   : > { %v729_v39 = vadd.f32 %v721_v45, %v2495_v59  ;;  %v746_v26 = vsel %vm325_vm1, %v730_v14, -inf }
 0x2ba   : > { %v712_v54 = vpop.f32.mrf.mxu3  ;;  %v743_v53 = vsel %vm325_vm1, %v729_v39, -inf }
 0x2bb   : > { %v676_v35 = vpop.f32.mrf.mxu2  ;;  %v595_v36 = vpop.f32.mrf.mxu0  ;;  %v724_v57 = vmul.f32 0.35355338, %v712_v54 }
 0x2bc   : > { %v723_v37 = vmul.f32 0.35355338, %v676_v35  ;;  %v718_v40 = vmul.f32 0.35355338, %v595_v36  ;;  %v2675_v34 = vpop.permute.xlu0 %1122 }
 0x2bd   : > { %v2651_v13 = vadd.f32 %v724_v57, %v2466_v42 }
 0x2be   : > { %v2635_v41 = vadd.f32 %v723_v37, %v2501_v61  ;;  %v2638_v44 = vadd.f32 %v718_v40, %v2455_v33 }
 0x2bf   : > { %v752_v29 = vsel %vm325_vm1, %v2651_v13, -inf }
 0x2c0   : > { %v749_v51 = vsel %vm325_vm1, %v2635_v41, -inf  ;;  %v734_v52 = vsel %vm325_vm1, %v2638_v44, -inf }
 0x2c1   : > { %750 = vmax.xlane.f32.xlu2 %v749_v51  ;;  %735 = vmax.xlane.f32.xlu1 %v734_v52 }
 0x2c2   : > { %v715_v27 = vpop.f32.mrf.mxu3 }
 0x2c3   : > { %v598_v38 = vpop.f32.mrf.mxu0  ;;  %v725_v28 = vmul.f32 0.35355338, %v715_v27 }
 0x2c4   : > { %v719_v46 = vmul.f32 0.35355338, %v598_v38 }
 0x2c5   : > { %v733_v30 = vadd.f32 %v725_v28, %v2512_v15 }
 0x2c6   : > { %v727_v55 = vadd.f32 %v719_v46, %v2486_v50 }
 0x2c7   : > { %v755_v18 = vsel %vm325_vm1, %v733_v30, -inf }
 0x2c8   : > { %v737_v60 = vsel %vm325_vm1, %v727_v55, -inf }
 0x2c9   : > { %744 = vmax.xlane.f32.xlu1 %v743_v53  ;;  %738 = vmax.xlane.f32.xlu0 %v737_v60 }
 0x2d1   : > { %753 = vmax.xlane.f32.xlu1 %v752_v29  ;;  %747 = vmax.xlane.f32.xlu0 %v746_v26 }
 0x2d9   : > { %1009 = vrot.lane.b32.xlu2 %v2359_v2, %s2307_s7 }
 0x2e5   : > { %1048 = vrot.lane.b32.xlu0 %v2369_v5, %s2307_s7 }
 0x2ea   : > { %1007 = vrot.lane.b32.xlu1 %v2378_v7, %s2307_s7 }
 0x30f   : > { %756 = vmax.xlane.f32.xlu0 %v755_v18 }
 0x323   : > { %1046 = vrot.lane.b32.xlu0 %v2375_v6, %s2307_s7  ;;  %s2315_s7 = smov 16  }
 0x326   : > { %v742_v45 = vpop.xlane.xlu2 %741 }
 0x327   : > { %v760_v47 = vsub.f32 %v2628_v24, %v742_v45 }
 0x329   : > { %v770_v9 = vmul.f32 1.442695, %v760_v47 }
 0x334   : > { %v736_v35 = vpop.xlane.xlu1 %735  ;;  %v751_v53 = vpop.xlane.xlu2 %750 }
 0x335   : > { %v758_v36 = vsub.f32 %v2638_v44, %v736_v35 }
 0x337   : > { %v766_v38 = vmul.f32 1.442695, %v758_v36 }
 0x33c   : > { %v745_v37 = vpop.xlane.xlu1 %744  ;;  %v739_v40 = vpop.xlane.xlu0 %738 }
 0x33d   : > { %v761_v51 = vsub.f32 %v729_v39, %v745_v37  ;;  %v759_v52 = vsub.f32 %v727_v55, %v739_v40  ;;  %v763_v39 = vsub.f32 %v2635_v41, %v751_v53  ;;  %v1010_v35 = vpop.permute.xlu2 %1009 }
 0x33e   : > { %1997 = vmatpush.xpose.msk.msra.mxu0 %vm166_vm0, %v1010_v35 }
 0x33f   : > { %v772_v54 = vmul.f32 1.442695, %v761_v51  ;;  %v768_v46 = vmul.f32 1.442695, %v759_v52  ;;  %v776_v63 = vmul.f32 1.442695, %v763_v39 }
 0x341   : > { %2183 = vpow2.f32 %v772_v54 }
 0x342   : > { %2185 = vpow2.f32 %v768_v46 }
 0x343   : > { %2187 = vpow2.f32 %v766_v38 }
 0x344   : > { %v748_v49 = vpop.xlane.xlu0 %747  ;;  %v754_v55 = vpop.xlane.xlu1 %753 }
 0x345   : > { %v762_v56 = vsub.f32 %v730_v14, %v748_v49  ;;  %v764_v14 = vsub.f32 %v2651_v13, %v754_v55 }
 0x347   : > { %v2679_v58 = vpop.eup %2183  ;;  %v774_v44 = vmul.f32 1.442695, %v762_v56  ;;  %v778_v26 = vmul.f32 1.442695, %v764_v14 }
 0x348   : > { %v2681_v12 = vpop.eup %2185  ;;  %v791_v57 = vsel %vm325_vm1, %v2679_v58, 0.0 }
 0x349   : > { %v2188_v60 = vpop.eup %2187  ;;  %792 = vadd.xlane.f32.xlu1 %v791_v57  ;;  %v785_v24 = vsel %vm325_vm1, %v2681_v12, 0.0  ;;  %2189 = vpow2.f32 %v774_v44 }
 0x34a   : > { %786 = vadd.xlane.f32.xlu2 %v785_v24  ;;  %2191 = vpow2.f32 %v770_v9  ;;  %v782_v29 = vsel %vm325_vm1, %v2188_v60, 0.0 }
 0x34b   : > { %2193 = vpow2.f32 %v776_v63 }
 0x34c   : > { %2195 = vpow2.f32 %v778_v26 }
 0x34d   : > { %783 = vadd.xlane.f32.xlu0 %v782_v29 }
 0x34f   : > { %v2190_v41 = vpop.eup %2189 }
 0x350   : > { %v2192_v62 = vpop.eup %2191  ;;  %v794_v8 = vsel %vm325_vm1, %v2190_v41, 0.0 }
 0x351   : > { %v788_v20 = vsel %vm325_vm1, %v2192_v62, 0.0  ;;  %v2194_v21 = vpop.eup %2193 }
 0x352   : > { %795 = vadd.xlane.f32.xlu2 %v794_v8  ;;  %v2196_v13 = vpop.eup %2195  ;;  %v797_v23 = vsel %vm325_vm1, %v2194_v21, 0.0 }
 0x353   : > { %v800_v25 = vsel %vm325_vm1, %v2196_v13, 0.0 }
 0x355   : > { %789 = vadd.xlane.f32.xlu0 %v788_v20 }
 0x357   : > { %v1049_v22 = vpop.permute.xlu0 %1048 }
 0x358   : > { %2001 = vmatpush.xpose.msk.msra.mxu1 %vm166_vm0, %v1049_v22 }
 0x35a   : > { %798 = vadd.xlane.f32.xlu2 %v797_v23 }
 0x35c   : > { %v1008_v40 = vpop.permute.xlu1 %1007 }
 0x35d   : > { %801 = vadd.xlane.f32.xlu0 %v800_v25  ;;  %1998 = vmatpush.xpose.msk.msra.mxu0 %vm166_vm0, %v1008_v40 }
 0x362   : > { %1044 = vrot.lane.b32.xlu1 %v2369_v5, %s2308_s8 }
 0x36a   : > { %1528 = vrot.lane.b32.xlu1 %v2351_v0, %s2310_s10 }
 0x372   : > { %1042 = vrot.lane.b32.xlu2 %v2375_v6, %s2308_s8  ;;  %2127 = vrot.lane.b32.xlu1 %v2411_v16, %s2311_s11 }
 0x37a   : > { %2117 = vrot.lane.b32.xlu2 %v2390_v10, %s2311_s11  ;;  %1526 = vrot.lane.b32.xlu1 %v2354_v1, %s2310_s10 }
 0x382   : > { %v757_v27 = vpop.xlane.xlu0 %756  ;;  %1522 = vrot.lane.b32.xlu2 %v2354_v1, %s2312_s17  ;;  %1565 = vrot.lane.b32.xlu1 %v2366_v4, %s2310_s10  ;;  %v2754_v1 = vld [vmem:[%s2348_s14 + $0x28] sm:$0xff] }
 0x383   : > { %v765_v28 = vsub.f32 %v733_v30, %v757_v27 }
 0x385   : > { %v780_v18 = vmul.f32 1.442695, %v765_v28 }
 0x387   : > { %2197 = vpow2.f32 %v780_v18 }
 0x38a   : > { %1561 = vrot.lane.b32.xlu1 %v2366_v4, %s2312_s17 }
 0x38d   : > { %v2198_v36 = vpop.eup %2197 }
 0x38e   : > { %v803_v37 = vsel %vm325_vm1, %v2198_v36, 0.0 }
 0x38f   : > { %804 = vadd.xlane.f32.xlu0 %v803_v37 }
 0x392   : > { %1489 = vrot.lane.b32.xlu1 %v2369_v5, %s2310_s10 }
 0x395   : > { %v1047_v45 = vpop.permute.xlu0 %1046 }
 0x396   : > { %2002 = vmatpush.xpose.msk.msra.mxu1 %vm166_vm0, %v1047_v45 }
 0x39a   : > { %1524 = vrot.lane.b32.xlu1 %v2754_v1, %s2312_s17 }
 0x3a3   : > { %1003 = vrot.lane.b32.xlu0 %v2378_v7, %s2308_s8 }
 0x3ab   : > { %1005 = vrot.lane.b32.xlu0 %v2359_v2, %s2308_s8  ;;  %s2316_s8 = smov 24  }
 0x3b3   : > { %2112 = vrot.lane.b32.xlu0 %v2394_v11, %s2311_s11 }
 0x3bb   : > { %2122 = vrot.lane.b32.xlu0 %v2442_v19, %s2311_s11 }
 0x3bc   : > { %v793_v0 = vpop.xlane.xlu1 %792 }
 0x3bd   : > { %v787_v6 = vpop.xlane.xlu2 %786 }
 0x3c0   : > { %v784_v30 = vpop.xlane.xlu0 %783 }
 0x3c1   : > { %2199 = vrcp.f32 %v784_v30 }
 0x3c3   : > { %1567 = vrot.lane.b32.xlu0 %v2363_v3, %s2310_s10 }
 0x3c5   : > { %v796_v51 = vpop.xlane.xlu2 %795 }
 0x3c6   : > { %2201 = vrcp.f32 %v796_v51 }
 0x3c7   : > { %v2200_v52 = vpop.eup %2199  ;;  %2203 = vrcp.f32 %v787_v6 }
 0x3c8   : > { %v814_v38 = vmul.f32 %v2200_v52, %v2188_v60  ;;  %v790_v54 = vpop.xlane.xlu0 %789 }
 0x3c9   : > { %2205 = vrcp.f32 %v790_v54 }
 0x3ca   : > { %1989 = vmatmul.msk.f32.vlgmr.msrb.gmra.mxu0 %vm325_vm1, %v814_v38 }
 0x3cb   : > { %1450 = vrot.lane.b32.xlu0 %v2359_v2, %s2310_s10 }
 0x3cc   : > { %v2202_v46 = vpop.eup %2201 }
 0x3cd   : > { %v2204_v47 = vpop.eup %2203  ;;  %v818_v49 = vmul.f32 %v2202_v46, %v2190_v41  ;;  %v799_v7 = vpop.xlane.xlu2 %798 }
 0x3ce   : > { %2207 = vrcp.f32 %v799_v7  ;;  %v815_v44 = vmul.f32 %v2204_v47, %v2681_v12 }
 0x3cf   : > { %v2206_v53 = vpop.eup %2205  ;;  %2209 = vrcp.f32 %v793_v0  ;;  %1993 = vmatmul.msk.f32.vlgmr.msrb.gmra.mxu2 %vm325_vm1, %v818_v49 }
 0x3d0   : > { %v816_v56 = vmul.f32 %v2206_v53, %v2192_v62  ;;  %v802_v9 = vpop.xlane.xlu0 %801 }
 0x3d1   : > { %2211 = vrcp.f32 %v802_v9 }
 0x3d2   : > { %1990 = vmatmul.msk.f32.gmra.mxu0 %vm325_vm1, %v815_v44  ;;  %1991 = vmatmul.msk.f32.vlgmr.msrb.gmra.mxu1 %vm325_vm1, %v816_v56 }
 0x3d3   : > { %1563 = vrot.lane.b32.xlu0 %v2363_v3, %s2312_s17 }
 0x3d4   : > { %v2208_v39 = vpop.eup %2207  ;;  %v1045_v63 = vpop.permute.xlu1 %1044 }
 0x3d5   : > { %v2210_v55 = vpop.eup %2209  ;;  %v819_v57 = vmul.f32 %v2208_v39, %v2194_v21  ;;  %v1043_v12 = vpop.permute.xlu2 %1042 }
 0x3d6   : > { %v817_v14 = vmul.f32 %v2210_v55, %v2679_v58 }
 0x3d7   : > { %v2212_v60 = vpop.eup %2211  ;;  %1994 = vmatmul.msk.f32.gmra.mxu2 %vm325_vm1, %v819_v57 }
 0x3d8   : > { %v820_v24 = vmul.f32 %v2212_v60, %v2196_v13 }
 0x3da   : > { %1992 = vmatmul.msk.f32.gmra.mxu1 %vm325_vm1, %v817_v14  ;;  %1995 = vmatmul.msk.f32.vlgmr.msrb.gmra.mxu3 %vm325_vm1, %v820_v24 }
 0x3dc   : > { %v1529_v28 = vpop.permute.xlu1 %1528 }
 0x3dd   : > { %v2118_v22 = vpop.permute.xlu2 %2117 }
 0x3de   : > { %v2120_v23 = vunpack.i.h.bf16 %v2118_v22  ;;  %v2119_v25 = vunpack.i.l.bf16 %v2118_v22 }
 0x3df   : > { %2007 = vmatmul.msk.f32.vlgmr.msra.gmra.mxu2 %vm166_vm0, %v2654_v48 }
 0x3e2   : > { %2003 = vmatmul.msk.f32.vlgmr.msra.gmra.mxu1 %vm166_vm0, %v1043_v12 }
 0x3e4   : > { %v2128_v47 = vpop.permute.xlu1 %2127 }
 0x3e5   : > { %v2130_v49 = vunpack.i.h.bf16 %v2128_v47  ;;  %v2129_v7 = vunpack.i.l.bf16 %v2128_v47 }
 0x3e7   : > { %2008 = vmatmul.msk.f32.gmra.mxu2 %vm166_vm0, %v2673_v31 }
 0x3ea   : > { %2004 = vmatmul.msk.f32.gmra.mxu1 %vm166_vm0, %v1045_v63 }
 0x3ec   : > { %v1527_v14 = vpop.permute.xlu1 %1526 }
 0x3f4   : > { %v1566_v63 = vpop.permute.xlu1 %1565 }
 0x402   : > { %v805_v58 = vpop.xlane.xlu0 %804 }
 0x403   : > { %2213 = vrcp.f32 %v805_v58  ;;  %v2810_v58 = vld [vmem:[%s2348_s14] sm:$0xff] }
 0x409   : > { %v2214_v48 = vpop.eup %2213 }
 0x40a   : > { %v821_v29 = vmul.f32 %v2214_v48, %v2198_v36 }
 0x40c   : > { %1996 = vmatmul.msk.f32.gmra.mxu3 %vm325_vm1, %v821_v29  ;;  %v2818_v29 = vld [vmem:[%s2348_s14 + $0x10] sm:$0xff] }
 0x414   : > { %2011 = vmatmul.msk.f32.vlgmr.msra.gmra.mxu3 %vm166_vm0, %v2660_v17 }
 0x415   : > { %v1004_v31 = vpop.permute.xlu0 %1003 }
 0x416   : > { %1999 = vmatmul.msk.f32.vlgmr.msra.gmra.mxu0 %vm166_vm0, %v1004_v31  ;;  %v2823_v31 = vpop.permute.xlu2 %1522 }
 0x41c   : > { %2012 = vmatmul.msk.f32.gmra.mxu3 %vm166_vm0, %v2675_v34 }
 0x41d   : > { %v1006_v10 = vpop.permute.xlu0 %1005 }
 0x41e   : > { %2000 = vmatmul.msk.f32.gmra.mxu0 %vm166_vm0, %v1006_v10 }
 0x425   : > { %v2113_v21 = vpop.permute.xlu0 %2112 }
 0x426   : > { %v2114_v13 = vunpack.i.l.bf16 %v2113_v21 }
 0x428   : > { %1359 = vmatpush.msrb.mxu2 %v2114_v13 }
 0x42a   : > { %1360 = vmatpush.msrb.mxu2 %v2119_v25 }
 0x42c   : > { %2029 = vmatpush.xpose.msk.msra.mxu2 %vm166_vm0, %v1529_v28 }
 0x42d   : > { %v2123_v52 = vpop.permute.xlu0 %2122 }
 0x42e   : > { %v2125_v46 = vunpack.i.h.bf16 %v2123_v52  ;;  %v2124_v0 = vunpack.i.l.bf16 %v2123_v52 }
 0x430   : > { %1289 = vmatpush.msrb.mxu0 %v2124_v0  ;;  %1324 = vmatpush.msrb.mxu1 %v2125_v46 }
 0x431   : > { %2030 = vmatpush.xpose.msk.msra.mxu2 %vm166_vm0, %v1527_v14  ;;  %v2852_v14 = vld [vmem:[%s2348_s14 + $0x8] sm:$0xff] }
 0x432   : > { %1290 = vmatpush.msrb.mxu0 %v2129_v7  ;;  %1325 = vmatpush.msrb.mxu1 %v2130_v49 }
 0x435   : > { %v1568_v57 = vpop.permute.xlu0 %1567 }
 0x447   : > { %v2774_v8 = vpop.f32.mrf.mxu0 }
 0x44f   : > { %v2751_v11 = vpop.f32.mrf.mxu1  ;;  %v2778_v27 = vpop.f32.mrf.mxu0 }
 0x452   : > { %v2758_v16 = vpop.f32.mrf.mxu2 }
 0x457   : > { %v2760_v19 = vpop.f32.mrf.mxu1 }
 0x45a   : > { %v2762_v2 = vpop.f32.mrf.mxu2 }
 0x45d   : > { %v2776_v20 = vpop.f32.mrf.mxu3 }
 0x45f   : > { %v1075_v4 = vpop.f32.mrf.mxu1 }
 0x460   : > { %v1161_v17 = vmul.f32 0.35355338, %v1075_v4 }
 0x462   : > { %v1114_v34 = vpop.f32.mrf.mxu2  ;;  %v2765_v3 = vadd.f32 %v1161_v17, %v2450_v32  ;;  %v2115_v32 = vunpack.i.h.bf16 %v2113_v21 }
 0x463   : > { %v1163_v5 = vmul.f32 0.35355338, %v1114_v34 }
 0x464   : > { %v1181_v26 = vsel %vm325_vm1, %v2765_v3, -inf  ;;  %1394 = vmatpush.msrb.mxu3 %v2115_v32 }
 0x465   : > { %1182 = vmax.xlane.f32.xlu2 %v1181_v26  ;;  %v2770_v41 = vadd.f32 %v1163_v5, %v2471_v43 }
 0x466   : > { %1395 = vmatpush.msrb.mxu3 %v2120_v23 }
 0x467   : > { %v1187_v62 = vsel %vm325_vm1, %v2770_v41, -inf  ;;  %v1078_v35 = vpop.f32.mrf.mxu1 }
 0x468   : > { %v1162_v40 = vmul.f32 0.35355338, %v1078_v35  ;;  %2033 = vmatpush.xpose.msk.msra.mxu3 %vm166_vm0, %v1568_v57 }
 0x46a   : > { %v2786_v30 = vadd.f32 %v1162_v40, %v2495_v59  ;;  %v1117_v38 = vpop.f32.mrf.mxu2 }
 0x46b   : > { %v1164_v56 = vmul.f32 0.35355338, %v1117_v38 }
 0x46c   : > { %2034 = vmatpush.xpose.msk.msra.mxu3 %vm166_vm0, %v1566_v63 }
 0x46d   : > { %1188 = vmax.xlane.f32.xlu2 %v1187_v62  ;;  %v2798_v60 = vadd.f32 %v1164_v56, %v2501_v61  ;;  %v2807_v61 = vpop.permute.xlu1 %1561 }
 0x475   : > { %v1490_v48 = vpop.permute.xlu1 %1489 }
 0x476   : > { %2025 = vmatpush.xpose.msk.msra.mxu1 %vm166_vm0, %v1490_v48 }
 0x47d   : > { %v2827_v17 = vpop.permute.xlu1 %1524 }
 0x48f   : > { %v2780_v43 = vpop.f32.mrf.mxu3 }
 0x493   : > { %v1036_v18 = vpop.f32.mrf.mxu0 }
 0x494   : > { %v1159_v36 = vmul.f32 0.35355338, %v1036_v18 }
 0x496   : > { %v1167_v37 = vadd.f32 %v1159_v36, %v2455_v33  ;;  %v1184_v33 = vsel %vm325_vm1, %v2786_v30, -inf }
 0x497   : > { %v1153_v45 = vpop.f32.mrf.mxu3 }
 0x498   : > { %v1175_v6 = vsel %vm325_vm1, %v1167_v37, -inf  ;;  %v1165_v59 = vmul.f32 0.35355338, %v1153_v45 }
 0x499   : > { %1176 = vmax.xlane.f32.xlu0 %v1175_v6 }
 0x49a   : > { %v1173_v24 = vadd.f32 %v1165_v59, %v2466_v42  ;;  %v1451_v42 = vpop.permute.xlu0 %1450 }
 0x49b   : > { %v1039_v51 = vpop.f32.mrf.mxu0  ;;  %2021 = vmatpush.xpose.msk.msra.mxu0 %vm166_vm0, %v1451_v42 }
 0x49c   : > { %v1160_v54 = vmul.f32 0.35355338, %v1039_v51  ;;  %v1193_v12 = vsel %vm325_vm1, %v1173_v24, -inf }
 0x49e   : > { %v1168_v53 = vadd.f32 %v1160_v54, %v2486_v50 }
 0x49f   : > { %v1156_v9 = vpop.f32.mrf.mxu3 }
 0x4a0   : > { %v1166_v44 = vmul.f32 0.35355338, %v1156_v9  ;;  %v1178_v39 = vsel %vm325_vm1, %v1168_v53, -inf }
 0x4a1   : > { %1179 = vmax.xlane.f32.xlu1 %v1178_v39  ;;  %1185 = vmax.xlane.f32.xlu0 %v1184_v33 }
 0x4a2   : > { %v2793_v55 = vadd.f32 %v1166_v44, %v2512_v15  ;;  %v1190_v15 = vsel %vm325_vm1, %v2798_v60, -inf  ;;  %v2825_v10 = vpop.permute.xlu0 %1563 }
 0x4a4   : > { %v1196_v50 = vsel %vm325_vm1, %v2793_v55, -inf }
 0x4a5   : > { %1197 = vmax.xlane.f32.xlu2 %v1196_v50 }
 0x4a9   : > { %1191 = vmax.xlane.f32.xlu1 %v1190_v15  ;;  %1194 = vmax.xlane.f32.xlu0 %v1193_v12 }
 0x4bd   : > { %1444 = vrot.lane.b32.xlu0 %v2810_v58, %s2312_s17  ;;  %1448 = vrot.lane.b32.xlu2 %v2810_v58, %s2310_s10 }
 0x4c2   : > { %1487 = vrot.lane.b32.xlu1 %v2818_v29, %s2310_s10 }
 0x4d8   : > { %v1183_v4 = vpop.xlane.xlu2 %1182 }
 0x4d9   : > { %v1201_v26 = vsub.f32 %v2765_v3, %v1183_v4 }
 0x4db   : > { %v1211_v21 = vmul.f32 1.442695, %v1201_v26 }
 0x4e0   : > { %v1189_v22 = vpop.xlane.xlu2 %1188 }
 0x4e1   : > { %v1203_v18 = vsub.f32 %v2770_v41, %v1189_v22 }
 0x4e3   : > { %v1215_v3 = vmul.f32 1.442695, %v1203_v18 }
 0x50c   : > { %v1177_v34 = vpop.xlane.xlu0 %1176 }
 0x50d   : > { %v1199_v5 = vsub.f32 %v1167_v37, %v1177_v34 }
 0x50f   : > { %v1207_v62 = vmul.f32 1.442695, %v1199_v5 }
 0x511   : > { %2215 = vpow2.f32 %v1207_v62 }
 0x512   : > { %2217 = vpow2.f32 %v1211_v21 }
 0x514   : > { %v1180_v32 = vpop.xlane.xlu1 %1179  ;;  %v1186_v13 = vpop.xlane.xlu0 %1185 }
 0x515   : > { %v1200_v23 = vsub.f32 %v1168_v53, %v1180_v32  ;;  %v1202_v25 = vsub.f32 %v2786_v30, %v1186_v13 }
 0x517   : > { %v2216_v28 = vpop.eup %2215  ;;  %v1209_v35 = vmul.f32 1.442695, %v1200_v23  ;;  %v1213_v36 = vmul.f32 1.442695, %v1202_v25 }
 0x518   : > { %v1223_v40 = vsel %vm325_vm1, %v2216_v28, 0.0  ;;  %v2218_v6 = vpop.eup %2217  ;;  %v1198_v51 = vpop.xlane.xlu2 %1197 }
 0x519   : > { %2219 = vpow2.f32 %v1209_v35  ;;  %1224 = vadd.xlane.f32.xlu1 %v1223_v40  ;;  %v1206_v41 = vsub.f32 %v2793_v55, %v1198_v51  ;;  %v1229_v47 = vsel %vm325_vm1, %v2218_v6, 0.0 }
 0x51a   : > { %2221 = vpow2.f32 %v1213_v36 }
 0x51b   : > { %2223 = vpow2.f32 %v1215_v3  ;;  %v1221_v53 = vmul.f32 1.442695, %v1206_v41 }
 0x51c   : > { %v1192_v37 = vpop.xlane.xlu1 %1191  ;;  %v1195_v45 = vpop.xlane.xlu0 %1194 }
 0x51d   : > { %v1205_v52 = vsub.f32 %v1173_v24, %v1195_v45  ;;  %v1204_v30 = vsub.f32 %v2798_v60, %v1192_v37  ;;  %v2845_v24 = vld [vmem:[%s2348_s14 + $0x18] sm:$0xff] }
 0x51f   : > { %v2220_v38 = vpop.eup %2219  ;;  %v1219_v54 = vmul.f32 1.442695, %v1205_v52  ;;  %v1217_v7 = vmul.f32 1.442695, %v1204_v30 }
 0x520   : > { %v2222_v46 = vpop.eup %2221  ;;  %v1226_v0 = vsel %vm325_vm1, %v2220_v38, 0.0  ;;  %v1449_v44 = vpop.permute.xlu2 %1448 }
 0x521   : > { %1227 = vadd.xlane.f32.xlu2 %v1226_v0  ;;  %v1232_v49 = vsel %vm325_vm1, %v2222_v46, 0.0  ;;  %1230 = vadd.xlane.f32.xlu1 %v1229_v47  ;;  %2225 = vpow2.f32 %v1219_v54  ;;  %v2224_v33 = vpop.eup %2223 }
 0x522   : > { %1233 = vadd.xlane.f32.xlu0 %v1232_v49  ;;  %2227 = vpow2.f32 %v1217_v7  ;;  %v1235_v9 = vsel %vm325_vm1, %v2224_v33, 0.0  ;;  %2022 = vmatpush.xpose.msk.msra.mxu0 %vm166_vm0, %v1449_v44 }
 0x523   : > { %2229 = vpow2.f32 %v1221_v53 }
 0x527   : > { %v2226_v56 = vpop.eup %2225 }
 0x528   : > { %v1241_v59 = vsel %vm325_vm1, %v2226_v56, 0.0  ;;  %v2228_v39 = vpop.eup %2227 }
 0x529   : > { %1236 = vadd.xlane.f32.xlu2 %v1235_v9  ;;  %1242 = vadd.xlane.f32.xlu1 %v1241_v59  ;;  %v2230_v55 = vpop.eup %2229  ;;  %v1238_v57 = vsel %vm325_vm1, %v2228_v39, 0.0 }
 0x52a   : > { %v1244_v50 = vsel %vm325_vm1, %v2230_v55, 0.0 }
 0x52f   : > { %v1445_v12 = vpop.permute.xlu0 %1444 }
 0x531   : > { %1239 = vadd.xlane.f32.xlu2 %v1238_v57  ;;  %1245 = vadd.xlane.f32.xlu1 %v1244_v50  ;;  %v2286_v57 = vld [vmem:[%s3068_s1 + $0x18] sm:$0xff] }
 0x534   : > { %v1488_v60 = vpop.permute.xlu1 %1487 }
 0x535   : > { %2026 = vmatpush.xpose.msk.msra.mxu1 %vm166_vm0, %v1488_v60 }
 0x536   : > { %1485 = vrot.lane.b32.xlu0 %v2845_v24, %s2312_s17 }
 0x549   : > { %1483 = vrot.lane.b32.xlu2 %v2818_v29, %s2312_s17 }
 0x54a   : > { %1446 = vrot.lane.b32.xlu1 %v2852_v14, %s2312_s17 }
 0x58c   : > { %v1225_v15 = vpop.xlane.xlu1 %1224 }
 0x58d   : > { %2231 = vrcp.f32 %v1225_v15 }
 0x593   : > { %v2232_v63 = vpop.eup %2231 }
 0x594   : > { %v1255_v42 = vmul.f32 %v2232_v63, %v2216_v28  ;;  %v1231_v48 = vpop.xlane.xlu1 %1230  ;;  %v1228_v4 = vpop.xlane.xlu2 %1227 }
 0x595   : > { %2233 = vrcp.f32 %v1231_v48  ;;  %v1234_v34 = vpop.xlane.xlu0 %1233 }
 0x596   : > { %2013 = vmatmul.msk.f32.vlgmr.msrb.gmra.mxu0 %vm325_vm1, %v1255_v42  ;;  %2235 = vrcp.f32 %v1228_v4 }
 0x597   : > { %2237 = vrcp.f32 %v1234_v34  ;;  %v2287_v34 = vld [vmem:[%s3068_s1 + $0x20] sm:$0xff] }
 0x59b   : > { %v2234_v5 = vpop.eup %2233 }
 0x59c   : > { %v1257_v26 = vmul.f32 %v2234_v5, %v2218_v6  ;;  %v1237_v62 = vpop.xlane.xlu2 %1236  ;;  %v2236_v21 = vpop.eup %2235 }
 0x59d   : > { %v1243_v22 = vpop.xlane.xlu1 %1242  ;;  %2239 = vrcp.f32 %v1237_v62  ;;  %v1256_v32 = vmul.f32 %v2236_v21, %v2220_v38  ;;  %v2238_v13 = vpop.eup %2237 }
 0x59e   : > { %2241 = vrcp.f32 %v1243_v22  ;;  %2015 = vmatmul.msk.f32.vlgmr.msrb.gmra.mxu1 %vm325_vm1, %v1257_v26  ;;  %v1258_v35 = vmul.f32 %v2238_v13, %v2222_v46  ;;  %v2288_v26 = vld [vmem:[%s3068_s1 + $0x30] sm:$0xff]  ;;  %v2289_v22 = vld [vmem:[%s3068_s1 + $0x8] sm:$0xff] }
 0x59f   : > { %2014 = vmatmul.msk.f32.gmra.mxu0 %vm325_vm1, %v1256_v32 }
 0x5a3   : > { %v2240_v23 = vpop.eup %2239 }
 0x5a4   : > { %v2242_v25 = vpop.eup %2241  ;;  %v1259_v28 = vmul.f32 %v2240_v23, %v2224_v33  ;;  %v1240_v18 = vpop.xlane.xlu2 %1239  ;;  %v2285_v33 = vld [vmem:[%s3068_s1 + $0x10] sm:$0xff] }
 0x5a5   : > { %v1261_v36 = vmul.f32 %v2242_v25, %v2226_v56  ;;  %v1246_v40 = vpop.xlane.xlu1 %1245  ;;  %2243 = vrcp.f32 %v1240_v18 }
 0x5a6   : > { %2245 = vrcp.f32 %v1246_v40  ;;  %2016 = vmatmul.msk.f32.gmra.mxu1 %vm325_vm1, %v1258_v35  ;;  %2017 = vmatmul.msk.f32.vlgmr.msrb.gmra.mxu2 %vm325_vm1, %v1259_v28 }
 0x5a7   : > { %2019 = vmatmul.msk.f32.vlgmr.msrb.gmra.mxu3 %vm325_vm1, %v1261_v36  ;;  %2023 = vmatmul.msk.f32.vlgmr.msra.gmra.mxu0 %vm166_vm0, %v1445_v12  ;;  %v2290_v36 = vld [vmem:[%s3068_s1 + $0x28] sm:$0xff] }
 0x5a8   : > { %v1486_v52 = vpop.permute.xlu0 %1485 }
 0x5ab   : > { %v2244_v3 = vpop.eup %2243 }
 0x5ac   : > { %v2246_v37 = vpop.eup %2245  ;;  %v1484_v45 = vpop.permute.xlu2 %1483  ;;  %v1260_v6 = vmul.f32 %v2244_v3, %v2228_v39  ;;  %v2291_v3 = vld [vmem:[%s3068_s1 + $0x38] sm:$0xff] }
 0x5ad   : > { %v1262_v51 = vmul.f32 %v2246_v37, %v2230_v55 }
 0x5ae   : > { %2018 = vmatmul.msk.f32.gmra.mxu2 %vm325_vm1, %v1260_v6  ;;  %2027 = vmatmul.msk.f32.vlgmr.msra.gmra.mxu1 %vm166_vm0, %v1484_v45 }
 0x5af   : > { %2020 = vmatmul.msk.f32.gmra.mxu3 %vm325_vm1, %v1262_v51 }
 0x5b6   : > { %2028 = vmatmul.msk.f32.gmra.mxu1 %vm166_vm0, %v1486_v52  ;;  %2031 = vmatmul.msk.f32.vlgmr.msra.gmra.mxu2 %vm166_vm0, %v2823_v31 }
 0x5b7   : > { %2035 = vmatmul.msk.f32.vlgmr.msra.gmra.mxu3 %vm166_vm0, %v2807_v61  ;;  %v2284_v61 = vld [vmem:[%s3068_s1] sm:$0xff] }
 0x5bc   : > { %v1447_v38 = vpop.permute.xlu1 %1446 }
 0x5bd   : > { %2024 = vmatmul.msk.f32.gmra.mxu0 %vm166_vm0, %v1447_v38 }
 0x5be   : > { %2032 = vmatmul.msk.f32.gmra.mxu2 %vm166_vm0, %v2827_v17 }
 0x5bf   : > { %2036 = vmatmul.msk.f32.gmra.mxu3 %vm166_vm0, %v2825_v10 }
 0x613   : > { %v2876_v30 = vpop.f32.mrf.mxu0 }
 0x61b   : > { %v2878_v54 = vpop.f32.mrf.mxu1 }
 0x61c   : > { %v2880_v46 = vpop.f32.mrf.mxu0 }
 0x623   : > { %v2882_v41 = vpop.f32.mrf.mxu1 }
 0x624   : > { %v1477_v31 = vpop.f32.mrf.mxu0 }
 0x625   : > { %v1600_v0 = vmul.f32 0.35355338, %v1477_v31 }
 0x627   : > { %v1608_v47 = vadd.f32 %v2284_v61, %v1600_v0 }
 0x629   : > { %v2887_v49 = vpop.f32.mrf.mxu2  ;;  %v1616_v17 = vsel %vm325_vm1, %v1608_v47, -inf }
 0x62a   : > { %v2890_v10 = vpop.f32.mrf.mxu3  ;;  %1617 = vmax.xlane.f32.xlu0 %v1616_v17 }
 0x62b   : > { %v1516_v7 = vpop.f32.mrf.mxu1 }
 0x62c   : > { %v1602_v53 = vmul.f32 0.35355338, %v1516_v7 }
 0x62e   : > { %v1610_v56 = vadd.f32 %v2285_v33, %v1602_v53 }
 0x630   : > { %v1622_v9 = vsel %vm325_vm1, %v1610_v56, -inf }
 0x631   : > { %1623 = vmax.xlane.f32.xlu2 %v1622_v9  ;;  %v2896_v59 = vpop.f32.mrf.mxu2 }
 0x632   : > { %v2898_v44 = vpop.f32.mrf.mxu3 }
 0x633   : > { %v1519_v39 = vpop.f32.mrf.mxu1 }
 0x634   : > { %v1603_v55 = vmul.f32 0.35355338, %v1519_v39 }
 0x636   : > { %v2903_v50 = vadd.f32 %v2286_v57, %v1603_v55 }
 0x638   : > { %v1625_v60 = vsel %vm325_vm1, %v2903_v50, -inf }
 0x639   : > { %1626 = vmax.xlane.f32.xlu1 %v1625_v60  ;;  %v1555_v15 = vpop.f32.mrf.mxu2 }
 0x63a   : > { %v1604_v12 = vmul.f32 0.35355338, %v1555_v15  ;;  %v1594_v63 = vpop.f32.mrf.mxu3  ;;  %v1480_v48 = vpop.f32.mrf.mxu0 }
 0x63b   : > { %v1606_v42 = vmul.f32 0.35355338, %v1594_v63  ;;  %v1601_v4 = vmul.f32 0.35355338, %v1480_v48  ;;  %v2293_v48 = vld [vmem:[%s2348_s14 + $0x30] sm:$0xff] }
 0x63c   : > { %v1612_v5 = vadd.f32 %v2287_v34, %v1604_v12 }
 0x63d   : > { %v1614_v62 = vadd.f32 %v2288_v26, %v1606_v42  ;;  %v2917_v32 = vadd.f32 %v2289_v22, %v1601_v4  ;;  %v2292_v42 = vld [vmem:[%s2348_s14 + $0x20] sm:$0xff] }
 0x63e   : > { %v1628_v21 = vsel %vm325_vm1, %v1612_v5, -inf  ;;  %v2136_v4 = vpack.i.bf16 %v2293_v48, %v2292_v42 }
 0x63f   : > { %1629 = vmax.xlane.f32.xlu2 %v1628_v21  ;;  %v1619_v13 = vsel %vm325_vm1, %v2917_v32, -inf  ;;  %v1634_v23 = vsel %vm325_vm1, %v1614_v62, -inf }
 0x640   : > { %1620 = vmax.xlane.f32.xlu0 %v1619_v13 }
 0x641   : > { %1635 = vmax.xlane.f32.xlu1 %v1634_v23  ;;  %v1558_v25 = vpop.f32.mrf.mxu2 }
 0x642   : > { %v1605_v28 = vmul.f32 0.35355338, %v1558_v25  ;;  %v1597_v18 = vpop.f32.mrf.mxu3 }
 0x643   : > { %v1607_v35 = vmul.f32 0.35355338, %v1597_v18 }
 0x644   : > { %v1613_v40 = vadd.f32 %v2290_v36, %v1605_v28 }
 0x645   : > { %v1615_v37 = vadd.f32 %v2291_v3, %v1607_v35 }
 0x646   : > { %v1631_v6 = vsel %vm325_vm1, %v1613_v40, -inf }
 0x647   : > { %v1637_v45 = vsel %vm325_vm1, %v1615_v37, -inf }
 0x648   : > { %1638 = vmax.xlane.f32.xlu2 %v1637_v45 }
 0x649   : > { %1632 = vmax.xlane.f32.xlu1 %v1631_v6 }
 0x69d   : > { %v1618_v51 = vpop.xlane.xlu0 %1617 }
 0x69e   : > { %v1640_v52 = vsub.f32 %v1608_v47, %v1618_v51  ;;  %v2146_v51 = vpack.i.bf16 %v2818_v29, %v2810_v58 }
 0x6a0   : > { %v1648_v38 = vmul.f32 1.442695, %v1640_v52 }
 0x6a2   : > { %2247 = vpow2.f32 %v1648_v38 }
 0x6a4   : > { %v1624_v31 = vpop.xlane.xlu2 %1623 }
 0x6a5   : > { %v1642_v0 = vsub.f32 %v1610_v56, %v1624_v31 }
 0x6a7   : > { %v1652_v61 = vmul.f32 1.442695, %v1642_v0 }
 0x6a8   : > { %v2930_v17 = vpop.eup %2247 }
 0x6a9   : > { %2249 = vpow2.f32 %v1652_v61  ;;  %v1664_v7 = vsel %vm325_vm1, %v2930_v17, 0.0 }
 0x6aa   : > { %1665 = vadd.xlane.f32.xlu1 %v1664_v7 }
 0x6ac   : > { %v1627_v53 = vpop.xlane.xlu1 %1626 }
 0x6ad   : > { %v1643_v23 = vsub.f32 %v2903_v50, %v1627_v53 }
 0x6af   : > { %v2934_v33 = vpop.eup %2249  ;;  %v1654_v25 = vmul.f32 1.442695, %v1643_v23 }
 0x6b0   : > { %v1670_v47 = vsel %vm325_vm1, %v2934_v33, 0.0 }
 0x6b1   : > { %1671 = vadd.xlane.f32.xlu2 %v1670_v47 }
 0x6b2   : > { %v1630_v9 = vpop.xlane.xlu2 %1629 }
 0x6b3   : > { %v1644_v39 = vsub.f32 %v1612_v5, %v1630_v9  ;;  %v2294_v5 = vld [vmem:[%s2348_s14 + $0x38] sm:$0xff]  ;;  %v1621_v18 = vpop.xlane.xlu0 %1620  ;;  %s2314_s14 = smov 8  }
 0x6b4   : > { %v1636_v56 = vpop.xlane.xlu1 %1635  ;;  %v2131_v26 = vpack.i.bf16 %v2294_v5, %v2754_v1  ;;  %v1641_v1 = vsub.f32 %v2917_v32, %v1621_v18 }
 0x6b5   : > { %v1656_v55 = vmul.f32 1.442695, %v1644_v39  ;;  %v1646_v57 = vsub.f32 %v1614_v62, %v1636_v56  ;;  %v2141_v62 = vpack.i.bf16 %v2845_v24, %v2852_v14 }
 0x6b6   : > { %v1650_v36 = vmul.f32 1.442695, %v1641_v1 }
 0x6b7   : > { %2251 = vpow2.f32 %v1656_v55  ;;  %v1660_v60 = vmul.f32 1.442695, %v1646_v57 }
 0x6b9   : > { %2253 = vpow2.f32 %v1660_v60 }
 0x6bb   : > { %v1639_v35 = vpop.xlane.xlu2 %1638 }
 0x6bc   : > { %v1633_v21 = vpop.xlane.xlu1 %1632  ;;  %v1647_v14 = vsub.f32 %v1615_v37, %v1639_v35 }
 0x6bd   : > { %v2938_v15 = vpop.eup %2251  ;;  %v1645_v22 = vsub.f32 %v1613_v40, %v1633_v21 }
 0x6be   : > { %v1676_v12 = vsel %vm325_vm1, %v2938_v15, 0.0  ;;  %v1662_v40 = vmul.f32 1.442695, %v1647_v14 }
 0x6bf   : > { %1677 = vadd.xlane.f32.xlu2 %v1676_v12  ;;  %v2942_v63 = vpop.eup %2253  ;;  %v1658_v13 = vmul.f32 1.442695, %v1645_v22 }
 0x6c0   : > { %v1682_v34 = vsel %vm325_vm1, %v2942_v63, 0.0 }
 0x6c1   : > { %1683 = vadd.xlane.f32.xlu0 %v1682_v34  ;;  %2255 = vpow2.f32 %v1658_v13 }
 0x6c2   : > { %2257 = vpow2.f32 %v1654_v25 }
 0x6c3   : > { %2137 = vrot.lane.b32.xlu1 %v2136_v4, %s2313_s6  ;;  %2259 = vpow2.f32 %v1650_v36 }
 0x6c4   : > { %2261 = vpow2.f32 %v1662_v40 }
 0x6c7   : > { %v2956_v28 = vpop.eup %2255 }
 0x6c8   : > { %v1679_v24 = vsel %vm325_vm1, %v2956_v28, 0.0  ;;  %v2961_v3 = vpop.eup %2257 }
 0x6c9   : > { %v1673_v50 = vsel %vm325_vm1, %v2961_v3, 0.0  ;;  %v2965_v45 = vpop.eup %2259 }
 0x6ca   : > { %v2967_v6 = vpop.eup %2261  ;;  %v1667_v32 = vsel %vm325_vm1, %v2965_v45, 0.0 }
 0x6cb   : > { %v1685_v37 = vsel %vm325_vm1, %v2967_v6, 0.0 }
 0x6d5   : > { %2132 = vrot.lane.b32.xlu0 %v2131_v26, %s2313_s6 }
 0x6d7   : > { %2142 = vrot.lane.b32.xlu2 %v2141_v62, %s2313_s6 }
 0x6ed   : > { %1680 = vadd.xlane.f32.xlu1 %v1679_v24 }
 0x6f5   : > { %1674 = vadd.xlane.f32.xlu1 %v1673_v50 }
 0x6ff   : > { %1668 = vadd.xlane.f32.xlu0 %v1667_v32 }
 0x700   : > { %1686 = vadd.xlane.f32.xlu2 %v1685_v37 }
 0x70e   : > { %980 = vrot.lane.b32.xlu1 %v2762_v2, %s2314_s14 }
 0x713   : > { %974 = vrot.lane.b32.xlu0 %v2751_v11, %s2314_s14 }
 0x716   : > { %1419 = vrot.lane.b32.xlu1 %v2887_v49, %s2315_s7 }
 0x718   : > { %2147 = vrot.lane.b32.xlu2 %v2146_v51, %s2313_s6 }
 0x71b   : > { %984 = vrot.lane.b32.xlu0 %v2780_v43, %s2314_s14 }
 0x71d   : > { %v1666_v29 = vpop.xlane.xlu1 %1665 }
 0x71e   : > { %1425 = vrot.lane.b32.xlu1 %v2898_v44, %s2315_s7 }
 0x720   : > { %970 = vrot.lane.b32.xlu2 %v2774_v8, %s2314_s14 }
 0x723   : > { %1413 = vrot.lane.b32.xlu0 %v2880_v46, %s2315_s7 }
 0x724   : > { %v1672_v11 = vpop.xlane.xlu2 %1671 }
 0x728   : > { %972 = vrot.lane.b32.xlu2 %v2778_v27, %s2314_s14 }
 0x72b   : > { %1417 = vrot.lane.b32.xlu0 %v2882_v41, %s2315_s7 }
 0x730   : > { %976 = vrot.lane.b32.xlu2 %v2760_v19, %s2314_s14 }
 0x732   : > { %v1678_v2 = vpop.xlane.xlu2 %1677 }
 0x733   : > { %1423 = vrot.lane.b32.xlu0 %v2890_v10, %s2315_s7  ;;  %2263 = vrcp.f32 %v1678_v2 }
 0x734   : > { %v1684_v46 = vpop.xlane.xlu0 %1683 }
 0x735   : > { %2265 = vrcp.f32 %v1684_v46  ;;  %v2138_v27 = vpop.permute.xlu1 %2137 }
 0x736   : > { %v2140_v44 = vunpack.i.h.bf16 %v2138_v27  ;;  %v2139_v52 = vunpack.i.l.bf16 %v2138_v27 }
 0x738   : > { %978 = vrot.lane.b32.xlu2 %v2758_v16, %s2314_s14 }
 0x739   : > { %v2264_v41 = vpop.eup %2263 }
 0x73a   : > { %v2143_v43 = vpop.permute.xlu2 %2142  ;;  %v1700_v38 = vmul.f32 %v2264_v41, %v2938_v15 }
 0x73b   : > { %v2145_v58 = vunpack.i.h.bf16 %v2143_v43  ;;  %v2144_v8 = vunpack.i.l.bf16 %v2143_v43  ;;  %v2266_v49 = vpop.eup %2265 }
 0x73c   : > { %v1702_v31 = vmul.f32 %v2266_v49, %v2942_v63 }
 0x73d   : > { %1730 = vmatpush.msrb.mxu0 %v2144_v8  ;;  %1765 = vmatpush.msrb.mxu1 %v2145_v58 }
 0x740   : > { %982 = vrot.lane.b32.xlu2 %v2776_v20, %s2314_s14 }
 0x747   : > { %v2133_v19 = vpop.permute.xlu0 %2132 }
 0x748   : > { %1411 = vrot.lane.b32.xlu2 %v2876_v30, %s2315_s7  ;;  %v2135_v10 = vunpack.i.h.bf16 %v2133_v19  ;;  %v2134_v16 = vunpack.i.l.bf16 %v2133_v19 }
 0x74a   : > { %1800 = vmatpush.msrb.mxu2 %v2134_v16  ;;  %1835 = vmatpush.msrb.mxu3 %v2135_v10 }
 0x74c   : > { %1801 = vmatpush.msrb.mxu2 %v2139_v52  ;;  %1836 = vmatpush.msrb.mxu3 %v2140_v44 }
 0x74d   : > { %2041 = vmatmul.msk.f32.vlgmr.msrb.gmra.mxu2 %vm325_vm1, %v1700_v38  ;;  %2043 = vmatmul.msk.f32.vlgmr.msrb.gmra.mxu3 %vm325_vm1, %v1702_v31 }
 0x750   : > { %1415 = vrot.lane.b32.xlu2 %v2878_v54, %s2315_s7 }
 0x758   : > { %1421 = vrot.lane.b32.xlu2 %v2896_v59, %s2315_s7 }
 0x760   : > { %v1681_v20 = vpop.xlane.xlu1 %1680 }
 0x761   : > { %2267 = vrcp.f32 %v1681_v20 }
 0x762   : > { %2269 = vrcp.f32 %v1666_v29 }
 0x763   : > { %2271 = vrcp.f32 %v1672_v11 }
 0x767   : > { %v2268_v30 = vpop.eup %2267 }
 0x768   : > { %v1701_v0 = vmul.f32 %v2268_v30, %v2956_v28  ;;  %v2270_v7 = vpop.eup %2269  ;;  %v1675_v53 = vpop.xlane.xlu1 %1674 }
 0x769   : > { %v2272_v9 = vpop.eup %2271  ;;  %v1696_v57 = vmul.f32 %v2270_v7, %v2930_v17 }
 0x76a   : > { %2042 = vmatmul.msk.f32.gmra.mxu2 %vm325_vm1, %v1701_v0  ;;  %v1698_v60 = vmul.f32 %v2272_v9, %v2934_v33 }
 0x772   : > { %v1669_v47 = vpop.xlane.xlu0 %1668 }
 0x773   : > { %v1687_v61 = vpop.xlane.xlu2 %1686 }
 0x774   : > { %2273 = vrcp.f32 %v1687_v61 }
 0x775   : > { %2275 = vrcp.f32 %v1669_v47 }
 0x776   : > { %2277 = vrcp.f32 %v1675_v53 }
 0x77a   : > { %v2274_v39 = vpop.eup %2273 }
 0x77b   : > { %v2148_v54 = vpop.permute.xlu2 %2147  ;;  %v1703_v55 = vmul.f32 %v2274_v39, %v2967_v6  ;;  %v2276_v12 = vpop.eup %2275 }
 0x77c   : > { %v2150_v59 = vunpack.i.h.bf16 %v2148_v54  ;;  %v2149_v56 = vunpack.i.l.bf16 %v2148_v54  ;;  %v2278_v17 = vpop.eup %2277  ;;  %v1697_v33 = vmul.f32 %v2276_v12, %v2965_v45 }
 0x77d   : > { %2044 = vmatmul.msk.f32.gmra.mxu3 %vm325_vm1, %v1703_v55  ;;  %v1699_v48 = vmul.f32 %v2278_v17, %v2961_v3 }
 0x77e   : > { %1731 = vmatpush.msrb.mxu0 %v2149_v56  ;;  %1766 = vmatpush.msrb.mxu1 %v2150_v59 }
 0x77f   : > { %2037 = vmatmul.msk.f32.vlgmr.msrb.gmra.mxu0 %vm325_vm1, %v1696_v57  ;;  %2039 = vmatmul.msk.f32.vlgmr.msrb.gmra.mxu1 %vm325_vm1, %v1698_v60 }
 0x780   : > { %v981_v15 = vpop.permute.xlu1 %980 }
 0x781   : > { %1000 = vst.msk [vmem:[%s2611_s16 + $0x28] sm:$0xff] %vm994_vm2, %v981_v15 }
 0x783   : > { %v971_v63 = vpop.permute.xlu2 %970 }
 0x784   : > { %995 = vst.msk [vmem:[%s2611_s16] sm:$0xff] %vm994_vm2, %v971_v63 }
 0x785   : > { %v975_v42 = vpop.permute.xlu0 %974 }
 0x786   : > { %997 = vst.msk [vmem:[%s2611_s16 + $0x10] sm:$0xff] %vm994_vm2, %v975_v42 }
 0x787   : > { %2038 = vmatmul.msk.f32.gmra.mxu0 %vm325_vm1, %v1697_v33  ;;  %2040 = vmatmul.msk.f32.gmra.mxu1 %vm325_vm1, %v1699_v48 }
 0x788   : > { %v1420_v4 = vpop.permute.xlu1 %1419 }
 0x78b   : > { %v973_v34 = vpop.permute.xlu2 %972 }
 0x78c   : > { %996 = vst.msk [vmem:[%s2611_s16 + $0x8] sm:$0xff] %vm994_vm2, %v973_v34 }
 0x78d   : > { %v985_v5 = vpop.permute.xlu0 %984 }
 0x78e   : > { %1002 = vst.msk [vmem:[%s2611_s16 + $0x38] sm:$0xff] %vm994_vm2, %v985_v5 }
 0x790   : > { %v1426_v26 = vpop.permute.xlu1 %1425 }
 0x791   : > { %1443 = vst.msk [vmem:[%s2611_s16 + $0x38] sm:$0xff] %vm1435_vm3, %v1426_v26 }
 0x793   : > { %v977_v62 = vpop.permute.xlu2 %976 }
 0x794   : > { %998 = vst.msk [vmem:[%s2611_s16 + $0x18] sm:$0xff] %vm994_vm2, %v977_v62 }
 0x795   : > { %v1414_v21 = vpop.permute.xlu0 %1413 }
 0x796   : > { %1437 = vst.msk [vmem:[%s2611_s16 + $0x8] sm:$0xff] %vm1435_vm3, %v1414_v21 }
 0x79b   : > { %v979_v22 = vpop.permute.xlu2 %978 }
 0x79c   : > { %999 = vst.msk [vmem:[%s2611_s16 + $0x20] sm:$0xff] %vm994_vm2, %v979_v22 }
 0x79d   : > { %1440 = vst.msk [vmem:[%s2611_s16 + $0x20] sm:$0xff] %vm1435_vm3, %v1420_v4  ;;  %v1418_v13 = vpop.permute.xlu0 %1417 }
 0x79e   : > { %1439 = vst.msk [vmem:[%s2611_s16 + $0x18] sm:$0xff] %vm1435_vm3, %v1418_v13 }
 0x7a3   : > { %v983_v23 = vpop.permute.xlu2 %982 }
 0x7a4   : > { %1001 = vst.msk [vmem:[%s2611_s16 + $0x30] sm:$0xff] %vm994_vm2, %v983_v23 }
 0x7a5   : > { %v1424_v25 = vpop.permute.xlu0 %1423 }
 0x7a6   : > { %1442 = vst.msk [vmem:[%s2611_s16 + $0x30] sm:$0xff] %vm1435_vm3, %v1424_v25 }
 0x7ab   : > { %v1412_v28 = vpop.permute.xlu2 %1411 }
 0x7ac   : > { %1436 = vst.msk [vmem:[%s2611_s16] sm:$0xff] %vm1435_vm3, %v1412_v28 }
 0x7b3   : > { %v1416_v18 = vpop.permute.xlu2 %1415 }
 0x7b4   : > { %1438 = vst.msk [vmem:[%s2611_s16 + $0x10] sm:$0xff] %vm1435_vm3, %v1416_v18 }
 0x7bb   : > { %v1422_v35 = vpop.permute.xlu2 %1421 }
 0x7bc   : > { %1441 = vst.msk [vmem:[%s2611_s16 + $0x28] sm:$0xff] %vm1435_vm3, %v1422_v35 }
 0x7d0   : > { %v1803_v24 = vpop.f32.mrf.mxu2  ;;  %v1838_v50 = vpop.f32.mrf.mxu3 }
 0x7ed   : > { %v1806_v3 = vpop.f32.mrf.mxu2 }
 0x7fc   : > { %v1733_v1 = vpop.f32.mrf.mxu0  ;;  %v1768_v14 = vpop.f32.mrf.mxu1 }
 0x7fd   : > { %1852 = vrot.lane.b32.xlu2 %v1733_v1, %s2316_s8  ;;  %1856 = vrot.lane.b32.xlu1 %v1768_v14, %s2316_s8 }
 0x800   : > { %v1841_v45 = vpop.f32.mrf.mxu3 }
 0x804   : > { %v1736_v36 = vpop.f32.mrf.mxu0  ;;  %v1771_v40 = vpop.f32.mrf.mxu1 }
 0x805   : > { %1854 = vrot.lane.b32.xlu0 %v1736_v36, %s2316_s8  ;;  %1858 = vrot.lane.b32.xlu2 %v1771_v40, %s2316_s8 }
 0x806   : > { %1862 = vrot.lane.b32.xlu1 %v1806_v3, %s2316_s8 }
 0x80d   : > { %1860 = vrot.lane.b32.xlu0 %v1803_v24, %s2316_s8  ;;  %1864 = vrot.lane.b32.xlu2 %v1838_v50, %s2316_s8 }
 0x815   : > { %1866 = vrot.lane.b32.xlu0 %v1841_v45, %s2316_s8 }
 0x857   : > { %v1853_v6 = vpop.permute.xlu2 %1852 }
 0x858   : > { %1877 = vst.msk [vmem:[%s2611_s16] sm:$0xff] %vm1876_vm4, %v1853_v6 }
 0x85f   : > { %v1859_v32 = vpop.permute.xlu2 %1858 }
 0x860   : > { %1880 = vst.msk [vmem:[%s2611_s16 + $0x18] sm:$0xff] %vm1876_vm4, %v1859_v32 }
 0x867   : > { %v1865_v37 = vpop.permute.xlu2 %1864 }
 0x868   : > { %1883 = vst.msk [vmem:[%s2611_s16 + $0x30] sm:$0xff] %vm1876_vm4, %v1865_v37 }
 0x86f   : > { %v1857_v51 = vpop.permute.xlu1 %1856 }
 0x870   : > { %1879 = vst.msk [vmem:[%s2611_s16 + $0x10] sm:$0xff] %vm1876_vm4, %v1857_v51 }
 0x877   : > { %v1855_v11 = vpop.permute.xlu0 %1854 }
 0x878   : > { %1878 = vst.msk [vmem:[%s2611_s16 + $0x8] sm:$0xff] %vm1876_vm4, %v1855_v11  ;;  %v1863_v2 = vpop.permute.xlu1 %1862 }
 0x879   : > { %1882 = vst.msk [vmem:[%s2611_s16 + $0x28] sm:$0xff] %vm1876_vm4, %v1863_v2 }
 0x87f   : > { %v1861_v43 = vpop.permute.xlu0 %1860 }
 0x880   : > { %1881 = vst.msk [vmem:[%s2611_s16 + $0x20] sm:$0xff] %vm1876_vm4, %v1861_v43 }
 0x887   : > { %v1867_v58 = vpop.permute.xlu0 %1866 }
 0x888   : > { %1884 = vst.msk [vmem:[%s2611_s16 + $0x38] sm:$0xff] %vm1876_vm4, %v1867_v58 }
 0x889 PF: > { %s12_s9 = sadd.s32 1, %s2301_s9  }
 0x88a   : > { %p9_p4 = scmp.ge.s32.totalorder %s12_s9, 4  }
 0x88c   :  { %11 = sbr.rel (!%p9_p4) target bundleno = 1 (0x1), region = 58 }

</bundles_post_ra>
